<compile_context>
chip_gen: v5e
topology: v5e:2x2
jax: 0.10.0
libtpu: 0.0.40
codegen_flags: <defaults>
</compile_context>

<pallas_src>
import functools

import jax
import jax.numpy as jnp
from jax.experimental import pallas as pl
from jax.experimental.pallas import tpu as pltpu


# -----------------------------------------------------------------------------
# Fused forward kernel.
# -----------------------------------------------------------------------------
def _aen_fused_kernel(ctx_ref, tgt_ref, lens_ref, blob_ref, o_ref,
                      *, offsets, batch, len_c, len_t, feat, n_head):
    f32 = jnp.float32
    B, Lc, Lt, F, H = batch, len_c, len_t, feat, n_head

    def W(name):
        r, nr, nc = offsets[name]          # static python ints -> cheap slices
        return blob_ref[r:r + nr, 0:nc]

    # Structural constants (precomputed at pack time, arrive in the single blob DMA).
    EQ, DK, DSB2 = W('EQ'), W('DK'), W('DSB2')          # (H,C) (B*Lc,C) (C,C)
    P2, HM2 = W('P2'), W('HM2')                         # (C,B*Lc) (C,F)
    BM_CC, BM_TC = W('BM_CC'), W('BM_TC')               # (B*Lc,C) (B*Lt,C)
    POOL_C, POOL_T = W('POOL_C'), W('POOL_T')           # (B,B*Lc) (B,B*Lt)

    def attention(kx, sk, sq, bmask):
        """Block-diagonal, lane-dense multi-head 'mlp' attention.

        kx:(B*Lc,F) per-key values, sk:(B*Lc,H) key scores, sq:(nq,H) query
        scores.  Score-slab columns are ordered (batch, key, head): C = B*Lc*H.
        """
        nq = sq.shape[0]
        # Broadcast sk into column space with two tiny MXU passes (no relayout).
        sk_cols = jnp.dot(sk, EQ, preferred_element_type=f32) * DK           # (B*Lc, C)
        sk_e = jnp.dot(jnp.ones((nq, B * Lc), f32), sk_cols,
                       preferred_element_type=f32)                           # (nq, C)
        score = jnp.tanh(jnp.dot(sq, EQ, preferred_element_type=f32) + sk_e)
        e = jnp.exp(score)                 # tanh-bounded -> no max subtraction needed
        denom = jnp.dot(e, DSB2, preferred_element_type=f32)  # per-(batch,head) sums
        attn = e * bmask / denom           # exact softmax; cross-batch columns zeroed
        v = jnp.dot(P2, kx, preferred_element_type=f32) * HM2                # (C, F)
        return jnp.dot(attn, v, preferred_element_type=f32)                  # (nq, F)

    ctx = ctx_ref[...]                                        # (B*Lc, E)
    tgt = tgt_ref[...]                                        # (B*Lt, E)

    # One wide matmul over context: attn_k's kx/sk/sq and attn_q's kx/sk.
    CP = jnp.dot(ctx, W('WC'), preferred_element_type=f32) + W('BC')         # (B*Lc, 2F+3H)
    kx0, sk0, sq0 = CP[:, 0:F], CP[:, F:F + H], CP[:, F + H:F + 2 * H]
    kx1, sk1 = CP[:, F + 2 * H:2 * F + 2 * H], CP[:, 2 * F + 2 * H:2 * F + 3 * H]
    # Target only needs attn_q's query score.
    sq1 = jnp.dot(tgt, W('WT'), preferred_element_type=f32) + W('BT')        # (B*Lt, H)

    av_k = attention(kx0, sk0, sq0, BM_CC)                    # (B*Lc, F)
    av_q = attention(kx1, sk1, sq1, BM_TC)                    # (B*Lt, F)

    # ffn_c: attn_k output proj folded into w1; attn_s1 key proj + key score
    # folded into w2 so this single matmul also emits kx2 / sk2.
    hid_c = jnp.maximum(
        jnp.dot(av_k, W('W1C'), preferred_element_type=f32) + W('B1C'), 0.0)
    CE = jnp.dot(hid_c, W('W2C'), preferred_element_type=f32) + W('B2C')     # (B*Lc, 2F+H)
    hc, kx2, sk2 = CE[:, 0:F], CE[:, F:2 * F], CE[:, 2 * F:2 * F + H]

    # ffn_t: attn_q output proj folded into w1; attn_s1 query score folded into w2.
    hid_t = jnp.maximum(
        jnp.dot(av_q, W('W1T'), preferred_element_type=f32) + W('B1T'), 0.0)
    TE = jnp.dot(hid_t, W('W2T'), preferred_element_type=f32) + W('B2T')     # (B*Lt, F+H)
    ht, sq2 = TE[:, 0:F], TE[:, F:F + H]

    av_s = attention(kx2, sk2, sq2, BM_TC)                    # (B*Lt, F), s1 pre-projection

    # Sequence-sum pooling (tiny row-selection matmuls) + dense head.
    # attn_s1's output projection wp2/bp2 is folded into WD2F / BD2.
    mc = jnp.dot(POOL_C, hc, preferred_element_type=f32)      # (B, F)
    ms = jnp.dot(POOL_T, av_s, preferred_element_type=f32)    # (B, F)
    mt = jnp.dot(POOL_T, ht, preferred_element_type=f32)      # (B, F)

    inv = 1.0 / lens_ref[...]                                 # (B, 2) exact reciprocals
    inv_c, inv_t = inv[:, 0:1], inv[:, 1:2]

    logits = ((jnp.dot(mc, W('WD1'), preferred_element_type=f32)
               + jnp.dot(ms, W('WD2F'), preferred_element_type=f32)
               + float(Lt) * W('BD2')) * inv_c        # original divides s1 by context_len
              + jnp.dot(mt, W('WD3'), preferred_element_type=f32) * inv_t
              + W('BD'))
    # NOTE: (B, polarities) store is narrow; lane-dense packing only matters if
    # this kernel is ever batched up to non-trivial output volume.
    o_ref[...] = logits.astype(o_ref.dtype)


# -----------------------------------------------------------------------------
# One-time parameter packing: weight folding + structural constants + one blob.
# -----------------------------------------------------------------------------
def _score_mats(wm, n_head):
    hd = wm.shape[0] // 2
    eye = jnp.eye(n_head, dtype=jnp.float32)
    wsk = jnp.kron(eye, wm[:hd].reshape(hd, 1))     # (H*hd, H): kx @ wsk -> sk per head
    wsq = jnp.kron(eye, wm[hd:].reshape(hd, 1))
    return wsk, wsq


def _build_blob(pieces):
    """Stack (name, array) pieces into one (R, width) f32 slab; each piece starts
    at lane 0 on an 8-aligned sublane.  Returns (blob, {name: (row, nrow, ncol)})."""
    arrs = []
    for name, a in pieces:
        a = jnp.asarray(a, jnp.float32)
        if a.ndim == 1:
            a = a.reshape(1, -1)
        arrs.append((name, a))
    width = max(a.shape[1] for _, a in arrs)
    rows, offsets, r = [], {}, 0
    for name, a in arrs:
        nr, nc = a.shape
        nr_pad = -(-nr // 8) * 8
        block = jnp.zeros((nr_pad, width), jnp.float32).at[:nr, :nc].set(a)
        rows.append(block)
        offsets[name] = (r, nr, nc)
        r += nr_pad
    return jnp.concatenate(rows, axis=0), offsets


def pack_params(params, n_head, batch, len_c, len_t):
    f32 = jnp.float32
    wk0, bk0, wq0, bq0, wm0, wp0, bp0 = params['attn_k']
    wk1, bk1, wq1, bq1, wm1, wp1, bp1 = params['attn_q']
    wk2, bk2, wq2, bq2, wm2, wp2, bp2 = params['attn_s1']
    w1c, b1c, w2c, b2c = params['ffn_c']
    w1t, b1t, w2t, b2t = params['ffn_t']
    wd, bd = params['dense']

    E, F = wk0.shape
    H = n_head
    hd = F // H
    P = wd.shape[1]
    B, Lc, Lt = batch, len_c, len_t
    C = B * Lc * H

    wsk0, wsq0 = _score_mats(wm0, H)
    wsk1, wsq1 = _score_mats(wm1, H)
    wsk2, wsq2 = _score_mats(wm2, H)

    # --- pack-time weight folding (collapses dependent MXU passes) -----------
    WC = jnp.concatenate([wk0, wk0 @ wsk0, wq0 @ wsq0, wk1, wk1 @ wsk1], axis=1)
    BC = jnp.concatenate([bk0, bk0 @ wsk0, bq0 @ wsq0, bk1, bk1 @ wsk1])
    WT, BT = wq1 @ wsq1, bq1 @ wsq1

    W1C, B1C = wp0 @ w1c, bp0 @ w1c + b1c            # attn_k proj folded into ffn_c
    bkx2 = b2c @ wk2 + bk2
    W2C = jnp.concatenate([w2c, w2c @ wk2, w2c @ wk2 @ wsk2], axis=1)
    B2C = jnp.concatenate([b2c, bkx2, bkx2 @ wsk2])

    W1T, B1T = wp1 @ w1t, bp1 @ w1t + b1t            # attn_q proj folded into ffn_t
    bsq2 = b2t @ wq2 + bq2
    W2T = jnp.concatenate([w2t, w2t @ wq2 @ wsq2], axis=1)
    B2T = jnp.concatenate([b2t, bsq2 @ wsq2])

    WD1, WD2, WD3 = wd[:F], wd[F:2 * F], wd[2 * F:]
    WD2F, BD2 = wp2 @ WD2, bp2 @ WD2                 # attn_s1 proj folded into dense

    # --- structural constants (score-slab column order: batch, key, head) ----
    c = jnp.arange(C)
    cb, ck, ch = c // (Lc * H), (c % (Lc * H)) // H, c % H
    ckey = cb * Lc + ck
    rk = jnp.arange(B * Lc)
    EQ = (jnp.arange(H)[:, None] == ch[None, :]).astype(f32)           # head selector
    DK = (rk[:, None] == ckey[None, :]).astype(f32)                    # key selector
    DSB2 = ((cb[:, None] == cb[None, :]) &
            (ch[:, None] == ch[None, :])).astype(f32)                  # denom sum+bcast
    P2 = (ckey[:, None] == rk[None, :]).astype(f32)                    # key replicator
    HM2 = (ch[:, None] == jnp.arange(F)[None, :] // hd).astype(f32)    # per-head feat mask
    rq_c, rq_t = rk // Lc, jnp.arange(B * Lt) // Lt
    BM_CC = (rq_c[:, None] == cb[None, :]).astype(f32)                 # batch masks
    BM_TC = (rq_t[:, None] == cb[None, :]).astype(f32)
    POOL_C = (jnp.arange(B)[:, None] == rq_c[None, :]).astype(f32)     # seq-sum pooling
    POOL_T = (jnp.arange(B)[:, None] == rq_t[None, :]).astype(f32)

    blob, offsets = _build_blob([
        ('WC', WC), ('BC', BC), ('WT', WT), ('BT', BT),
        ('W1C', W1C), ('B1C', B1C), ('W2C', W2C), ('B2C', B2C),
        ('W1T', W1T), ('B1T', B1T), ('W2T', W2T), ('B2T', B2T),
        ('WD1', WD1), ('WD2F', WD2F), ('WD3', WD3), ('BD', bd), ('BD2', BD2),
        ('EQ', EQ), ('DK', DK), ('DSB2', DSB2), ('P2', P2), ('HM2', HM2),
        ('BM_CC', BM_CC), ('BM_TC', BM_TC), ('POOL_C', POOL_C), ('POOL_T', POOL_T),
    ])
    return {'emb': params['emb'], 'pos': params['pos'],
            'blob': blob, 'offsets': offsets,
            'dims': dict(batch=B, len_c=Lc, len_t=Lt, feat=F, n_head=H, pol=P)}


# -----------------------------------------------------------------------------
# Plain-JAX glue.
# -----------------------------------------------------------------------------
# TODO(synk): the pretrained `bert` encoder is an injected external submodule
# with no definition in this file; it is replaced by a deterministic token +
# position embedding lookup that feeds the Pallas hot path.
def bert_stub(tokens, emb, pos):
    return emb[tokens] + pos[: tokens.shape[1]][None, :, :]


def aen_bert_forward(context, target, packed):
    d = packed['dims']
    B, Lc, Lt = d['batch'], d['len_c'], d['len_t']
    F, H, P = d['feat'], d['n_head'], d['pol']
    assert context.shape == (B, Lc) and target.shape == (B, Lt)

    # context_len / target_len == torch.sum(x != 0, dim=-1)
    clen = jnp.sum(context != 0, axis=-1).astype(jnp.float32)
    tlen = jnp.sum(target != 0, axis=-1).astype(jnp.float32)
    lens = jnp.stack([clen, tlen], axis=-1)                    # (B, 2)

    # SqueezeEmbedding: truncate to batch-max length; inputs are built so the
    # batch max equals the padded width -> squeeze is an exact identity.
    ctx = bert_stub(context, packed['emb'], packed['pos'])     # (B, Lc, E)
    tgt = bert_stub(target, packed['emb'], packed['pos'])      # (B, Lt, E)
    E = ctx.shape[-1]
    # dropout: eval mode -> identity

    kernel = functools.partial(
        _aen_fused_kernel, offsets=packed['offsets'],
        batch=B, len_c=Lc, len_t=Lt, feat=F, n_head=H)

    # TODO(synk): at serving batch sizes add a leading batch-chunk grid with
    # dimension_semantics=("parallel",) so v7x's two TensorCores are both used;
    # on v5e/v6e a grid is a serial loop and would only add per-step overhead.
    return pl.pallas_call(
        kernel,
        out_shape=jax.ShapeDtypeStruct((B, P), jnp.float32),
        in_specs=[pl.BlockSpec(memory_space=pltpu.MemorySpace.VMEM)] * 4,
        out_specs=pl.BlockSpec(memory_space=pltpu.MemorySpace.VMEM),
    )(ctx.reshape(B * Lc, E), tgt.reshape(B * Lt, E), lens, packed['blob'])


# -----------------------------------------------------------------------------
# Pure-JAX reference (for correctness check only).
# -----------------------------------------------------------------------------
def _ref_attention(k, q, p, n_head):
    wk, bk, wq, bq, wmlp, wproj, bproj = p
    B, Lk, _ = k.shape
    Lq = q.shape[1]
    hd = wk.shape[1] // n_head
    kx = (k @ wk + bk).reshape(B, Lk, n_head, hd)
    qx = (q @ wq + bq).reshape(B, Lq, n_head, hd)
    sk = jnp.einsum('bkhd,d->bkh', kx, wmlp[:hd])
    sq = jnp.einsum('bqhd,d->bqh', qx, wmlp[hd:])
    score = jnp.tanh(sk[:, None, :, :] + sq[:, :, None, :])          # (B, Lq, Lk, H)
    attn = jax.nn.softmax(score, axis=2)
    out = jnp.einsum('bqkh,bkhd->bqhd', attn, kx).reshape(B, Lq, n_head * hd)
    return out @ wproj + bproj


def _ref_ffn(x, p):
    w1, b1, w2, b2 = p
    return jnp.maximum(x @ w1 + b1, 0.0) @ w2 + b2


def ref_forward(context, target, params, *, n_head=8):
    clen = jnp.sum(context != 0, axis=-1).astype(jnp.float32)
    tlen = jnp.sum(target != 0, axis=-1).astype(jnp.float32)
    ctx = bert_stub(context, params['emb'], params['pos'])
    tgt = bert_stub(target, params['emb'], params['pos'])
    hc = _ref_ffn(_ref_attention(ctx, ctx, params['attn_k'], n_head), params['ffn_c'])
    ht = _ref_ffn(_ref_attention(ctx, tgt, params['attn_q'], n_head), params['ffn_t'])
    s1 = _ref_attention(hc, ht, params['attn_s1'], n_head)
    hc_mean = hc.sum(1) / clen[:, None]
    ht_mean = ht.sum(1) / tlen[:, None]
    s1_mean = s1.sum(1) / clen[:, None]
    x = jnp.concatenate([hc_mean, s1_mean, ht_mean], axis=-1)
    wd, bd = params['dense']
    return x @ wd + bd


# -----------------------------------------------------------------------------
# Deterministic parameter construction (shapes match the PyTorch module,
# bert_dim -> 32, hidden_dim -> 32, n_head = 8, polarities_dim = 3).
# -----------------------------------------------------------------------------
def init_params(key, vocab, bert_dim, hidden_dim, n_head, polarities, max_len):
    keys = jax.random.split(key, 8)

    def dense_p(k, fan_in, fan_out):
        k1, k2 = jax.random.split(k)
        w = jax.random.normal(k1, (fan_in, fan_out), jnp.float32) * 0.08
        b = jax.random.normal(k2, (fan_out,), jnp.float32) * 0.02
        return w, b

    def attn_p(k, embed_dim, out_dim):
        hd = embed_dim // n_head
        ks = jax.random.split(k, 4)
        wk, bk = dense_p(ks[0], embed_dim, n_head * hd)
        wq, bq = dense_p(ks[1], embed_dim, n_head * hd)
        wmlp = jax.random.normal(ks[2], (2 * hd,), jnp.float32) * 0.3
        wproj, bproj = dense_p(ks[3], n_head * hd, out_dim)
        return (wk, bk, wq, bq, wmlp, wproj, bproj)

    def ffn_p(k, d):
        k1, k2 = jax.random.split(k)
        w1, b1 = dense_p(k1, d, d)
        w2, b2 = dense_p(k2, d, d)
        return (w1, b1, w2, b2)

    return {
        'emb': jax.random.normal(keys[0], (vocab, bert_dim), jnp.float32) * 0.1,
        'pos': jax.random.normal(keys[1], (max_len, bert_dim), jnp.float32) * 0.05,
        'attn_k': attn_p(keys[2], bert_dim, hidden_dim),
        'attn_q': attn_p(keys[3], bert_dim, hidden_dim),
        'attn_s1': attn_p(keys[4], hidden_dim, hidden_dim),
        'ffn_c': ffn_p(keys[5], hidden_dim),
        'ffn_t': ffn_p(keys[6], hidden_dim),
        'dense': dense_p(keys[7], hidden_dim * 3, polarities),
    }


if __name__ == "__main__":
    B, Lc, Lt = 2, 10, 6
    vocab, bert_dim, hidden_dim, n_head, polarities = 50, 32, 32, 8, 3

    key = jax.random.PRNGKey(0)
    k_tok, k_par = jax.random.split(key)
    kc, kt = jax.random.split(k_tok)
    context = jax.random.randint(kc, (B, Lc), 1, vocab, dtype=jnp.int32)
    target = jax.random.randint(kt, (B, Lt), 1, vocab, dtype=jnp.int32)
    # Row 0 full length (so SqueezeEmbedding is identity), row 1 padded shorter.
    context = context * (jnp.arange(Lc)[None, :] < jnp.array([[Lc], [7]])).astype(jnp.int32)
    target = target * (jnp.arange(Lt)[None, :] < jnp.array([[Lt], [4]])).astype(jnp.int32)

    params = init_params(k_par, vocab, bert_dim, hidden_dim, n_head, polarities,
                         max_len=max(Lc, Lt))
    # One-time packing: folded weights + structural constants -> one VMEM blob.
    packed = pack_params(params, n_head, B, Lc, Lt)

    fwd = jax.jit(lambda c, t: aen_bert_forward(c, t, packed))
    out = jax.block_until_ready(fwd(context, target))

    ref = ref_forward(context, target, params, n_head=n_head)
    assert out.shape == (B, polarities)
    err = float(jnp.max(jnp.abs(out - ref)))
    # f32 matmuls + exact softmax division throughout -> tight tolerance.
    if err < 1e-3:
        print("KERNEL_OK")
    else:
        print(f"MISMATCH max_abs_err={err}")
</pallas_src>

<mosaic_0001>
module attributes {stable_mosaic.version = 11 : i64} {
  func.func @_aen_fused_kernel(%arg0: memref<20x32xf32, #tpu.memory_space<vmem>>, %arg1: memref<12x32xf32, #tpu.memory_space<vmem>>, %arg2: memref<2x2xf32, #tpu.memory_space<vmem>>, %arg3: memref<920x160xf32, #tpu.memory_space<vmem>>, %arg4: memref<2x3xf32, #tpu.memory_space<vmem>>) attributes {dimension_semantics = [], scalar_prefetch = 0 : i64, scratch_operands = 0 : i64, tpu.core_type = #tpu.core_type<tc>} {
    %c352 = arith.constant 352 : index
    %c0 = arith.constant 0 : index
    %0 = vector.load %arg3[%c352, %c0] : memref<920x160xf32, #tpu.memory_space<vmem>>, vector<8x160xf32>
    %c360 = arith.constant 360 : index
    %c0_0 = arith.constant 0 : index
    %1 = vector.load %arg3[%c360, %c0_0] : memref<920x160xf32, #tpu.memory_space<vmem>>, vector<20x160xf32>
    %c384 = arith.constant 384 : index
    %c0_1 = arith.constant 0 : index
    %2 = vector.load %arg3[%c384, %c0_1] : memref<920x160xf32, #tpu.memory_space<vmem>>, vector<160x160xf32>
    %c544 = arith.constant 544 : index
    %c0_2 = arith.constant 0 : index
    %3 = vector.load %arg3[%c544, %c0_2] : memref<920x160xf32, #tpu.memory_space<vmem>>, vector<160x20xf32>
    %c704 = arith.constant 704 : index
    %c0_3 = arith.constant 0 : index
    %4 = vector.load %arg3[%c704, %c0_3] : memref<920x160xf32, #tpu.memory_space<vmem>>, vector<160x32xf32>
    %c864 = arith.constant 864 : index
    %c0_4 = arith.constant 0 : index
    %5 = vector.load %arg3[%c864, %c0_4] : memref<920x160xf32, #tpu.memory_space<vmem>>, vector<20x160xf32>
    %c888 = arith.constant 888 : index
    %c0_5 = arith.constant 0 : index
    %6 = vector.load %arg3[%c888, %c0_5] : memref<920x160xf32, #tpu.memory_space<vmem>>, vector<12x160xf32>
    %c904 = arith.constant 904 : index
    %c0_6 = arith.constant 0 : index
    %7 = vector.load %arg3[%c904, %c0_6] : memref<920x160xf32, #tpu.memory_space<vmem>>, vector<2x20xf32>
    %c912 = arith.constant 912 : index
    %c0_7 = arith.constant 0 : index
    %8 = vector.load %arg3[%c912, %c0_7] : memref<920x160xf32, #tpu.memory_space<vmem>>, vector<2x12xf32>
    %c0_8 = arith.constant 0 : index
    %c0_9 = arith.constant 0 : index
    %9 = vector.load %arg0[%c0_8, %c0_9] : memref<20x32xf32, #tpu.memory_space<vmem>>, vector<20x32xf32>
    %c0_10 = arith.constant 0 : index
    %c0_11 = arith.constant 0 : index
    %10 = vector.load %arg1[%c0_10, %c0_11] : memref<12x32xf32, #tpu.memory_space<vmem>>, vector<12x32xf32>
    %c0_12 = arith.constant 0 : index
    %c0_13 = arith.constant 0 : index
    %11 = vector.load %arg3[%c0_12, %c0_13] : memref<920x160xf32, #tpu.memory_space<vmem>>, vector<32x88xf32>
    %cst = arith.constant dense<0.000000e+00> : vector<20x88xf32>
    %12 = tpu.matmul %9, %11, %cst {dimension_numbers = #tpu.dot_dimension_numbers<[1], [0], [0], [1], [0, 0, 1, 1], [], []>} : vector<20x32xf32>, vector<32x88xf32>, vector<20x88xf32> -> vector<20x88xf32>
    %c32 = arith.constant 32 : index
    %c0_14 = arith.constant 0 : index
    %13 = vector.load %arg3[%c32, %c0_14] : memref<920x160xf32, #tpu.memory_space<vmem>>, vector<1x88xf32>
    %14 = vector.broadcast %13 : vector<1x88xf32> to vector<20x88xf32>
    %15 = arith.addf %12, %14 : vector<20x88xf32>
    %16 = vector.extract_strided_slice %15 {offsets = [0, 0], sizes = [20, 32], strides = [1, 1]} : vector<20x88xf32> to vector<20x32xf32>
    %17 = vector.extract_strided_slice %15 {offsets = [0, 32], sizes = [20, 8], strides = [1, 1]} : vector<20x88xf32> to vector<20x8xf32>
    %18 = vector.extract_strided_slice %15 {offsets = [0, 40], sizes = [20, 8], strides = [1, 1]} : vector<20x88xf32> to vector<20x8xf32>
    %19 = vector.extract_strided_slice %15 {offsets = [0, 48], sizes = [20, 32], strides = [1, 1]} : vector<20x88xf32> to vector<20x32xf32>
    %20 = vector.extract_strided_slice %15 {offsets = [0, 80], sizes = [20, 8], strides = [1, 1]} : vector<20x88xf32> to vector<20x8xf32>
    %c40 = arith.constant 40 : index
    %c0_15 = arith.constant 0 : index
    %21 = vector.load %arg3[%c40, %c0_15] : memref<920x160xf32, #tpu.memory_space<vmem>>, vector<32x8xf32>
    %cst_16 = arith.constant dense<0.000000e+00> : vector<12x8xf32>
    %22 = tpu.matmul %10, %21, %cst_16 {dimension_numbers = #tpu.dot_dimension_numbers<[1], [0], [0], [1], [0, 0, 1, 1], [], []>} : vector<12x32xf32>, vector<32x8xf32>, vector<12x8xf32> -> vector<12x8xf32>
    %c72 = arith.constant 72 : index
    %c0_17 = arith.constant 0 : index
    %23 = vector.load %arg3[%c72, %c0_17] : memref<920x160xf32, #tpu.memory_space<vmem>>, vector<1x8xf32>
    %24 = vector.broadcast %23 : vector<1x8xf32> to vector<12x8xf32>
    %25 = arith.addf %22, %24 : vector<12x8xf32>
    %cst_18 = arith.constant dense<0.000000e+00> : vector<20x160xf32>
    %26 = tpu.matmul %17, %0, %cst_18 {dimension_numbers = #tpu.dot_dimension_numbers<[1], [0], [0], [1], [0, 0, 1, 1], [], []>} : vector<20x8xf32>, vector<8x160xf32>, vector<20x160xf32> -> vector<20x160xf32>
    %27 = arith.mulf %26, %1 : vector<20x160xf32>
    %cst_19 = arith.constant 1.000000e+00 : f32
    %28 = vector.broadcast %cst_19 : f32 to vector<20x20xf32>
    %cst_20 = arith.constant dense<0.000000e+00> : vector<20x160xf32>
    %29 = tpu.matmul %28, %27, %cst_20 {dimension_numbers = #tpu.dot_dimension_numbers<[1], [0], [0], [1], [0, 0, 1, 1], [], []>} : vector<20x20xf32>, vector<20x160xf32>, vector<20x160xf32> -> vector<20x160xf32>
    %cst_21 = arith.constant dense<0.000000e+00> : vector<20x160xf32>
    %30 = tpu.matmul %18, %0, %cst_21 {dimension_numbers = #tpu.dot_dimension_numbers<[1], [0], [0], [1], [0, 0, 1, 1], [], []>} : vector<20x8xf32>, vector<8x160xf32>, vector<20x160xf32> -> vector<20x160xf32>
    %31 = arith.addf %30, %29 : vector<20x160xf32>
    %32 = math.tanh %31 : vector<20x160xf32>
    %33 = math.exp %32 : vector<20x160xf32>
    %cst_22 = arith.constant dense<0.000000e+00> : vector<20x160xf32>
    %34 = tpu.matmul %33, %2, %cst_22 {dimension_numbers = #tpu.dot_dimension_numbers<[1], [0], [0], [1], [0, 0, 1, 1], [], []>} : vector<20x160xf32>, vector<160x160xf32>, vector<20x160xf32> -> vector<20x160xf32>
    %35 = arith.mulf %33, %5 : vector<20x160xf32>
    %36 = arith.divf %35, %34 : vector<20x160xf32>
    %cst_23 = arith.constant dense<0.000000e+00> : vector<160x32xf32>
    %37 = tpu.matmul %3, %16, %cst_23 {dimension_numbers = #tpu.dot_dimension_numbers<[1], [0], [0], [1], [0, 0, 1, 1], [], []>} : vector<160x20xf32>, vector<20x32xf32>, vector<160x32xf32> -> vector<160x32xf32>
    %38 = arith.mulf %37, %4 : vector<160x32xf32>
    %cst_24 = arith.constant dense<0.000000e+00> : vector<20x32xf32>
    %39 = tpu.matmul %36, %38, %cst_24 {dimension_numbers = #tpu.dot_dimension_numbers<[1], [0], [0], [1], [0, 0, 1, 1], [], []>} : vector<20x160xf32>, vector<160x32xf32>, vector<20x32xf32> -> vector<20x32xf32>
    %cst_25 = arith.constant dense<0.000000e+00> : vector<20x160xf32>
    %40 = tpu.matmul %20, %0, %cst_25 {dimension_numbers = #tpu.dot_dimension_numbers<[1], [0], [0], [1], [0, 0, 1, 1], [], []>} : vector<20x8xf32>, vector<8x160xf32>, vector<20x160xf32> -> vector<20x160xf32>
    %41 = arith.mulf %40, %1 : vector<20x160xf32>
    %cst_26 = arith.constant 1.000000e+00 : f32
    %42 = vector.broadcast %cst_26 : f32 to vector<12x20xf32>
    %cst_27 = arith.constant dense<0.000000e+00> : vector<12x160xf32>
    %43 = tpu.matmul %42, %41, %cst_27 {dimension_numbers = #tpu.dot_dimension_numbers<[1], [0], [0], [1], [0, 0, 1, 1], [], []>} : vector<12x20xf32>, vector<20x160xf32>, vector<12x160xf32> -> vector<12x160xf32>
    %cst_28 = arith.constant dense<0.000000e+00> : vector<12x160xf32>
    %44 = tpu.matmul %25, %0, %cst_28 {dimension_numbers = #tpu.dot_dimension_numbers<[1], [0], [0], [1], [0, 0, 1, 1], [], []>} : vector<12x8xf32>, vector<8x160xf32>, vector<12x160xf32> -> vector<12x160xf32>
    %45 = arith.addf %44, %43 : vector<12x160xf32>
    %46 = math.tanh %45 : vector<12x160xf32>
    %47 = math.exp %46 : vector<12x160xf32>
    %cst_29 = arith.constant dense<0.000000e+00> : vector<12x160xf32>
    %48 = tpu.matmul %47, %2, %cst_29 {dimension_numbers = #tpu.dot_dimension_numbers<[1], [0], [0], [1], [0, 0, 1, 1], [], []>} : vector<12x160xf32>, vector<160x160xf32>, vector<12x160xf32> -> vector<12x160xf32>
    %49 = arith.mulf %47, %6 : vector<12x160xf32>
    %50 = arith.divf %49, %48 : vector<12x160xf32>
    %cst_30 = arith.constant dense<0.000000e+00> : vector<160x32xf32>
    %51 = tpu.matmul %3, %19, %cst_30 {dimension_numbers = #tpu.dot_dimension_numbers<[1], [0], [0], [1], [0, 0, 1, 1], [], []>} : vector<160x20xf32>, vector<20x32xf32>, vector<160x32xf32> -> vector<160x32xf32>
    %52 = arith.mulf %51, %4 : vector<160x32xf32>
    %cst_31 = arith.constant dense<0.000000e+00> : vector<12x32xf32>
    %53 = tpu.matmul %50, %52, %cst_31 {dimension_numbers = #tpu.dot_dimension_numbers<[1], [0], [0], [1], [0, 0, 1, 1], [], []>} : vector<12x160xf32>, vector<160x32xf32>, vector<12x32xf32> -> vector<12x32xf32>
    %c80 = arith.constant 80 : index
    %c0_32 = arith.constant 0 : index
    %54 = vector.load %arg3[%c80, %c0_32] : memref<920x160xf32, #tpu.memory_space<vmem>>, vector<32x32xf32>
    %cst_33 = arith.constant dense<0.000000e+00> : vector<20x32xf32>
    %55 = tpu.matmul %39, %54, %cst_33 {dimension_numbers = #tpu.dot_dimension_numbers<[1], [0], [0], [1], [0, 0, 1, 1], [], []>} : vector<20x32xf32>, vector<32x32xf32>, vector<20x32xf32> -> vector<20x32xf32>
    %c112 = arith.constant 112 : index
    %c0_34 = arith.constant 0 : index
    %56 = vector.load %arg3[%c112, %c0_34] : memref<920x160xf32, #tpu.memory_space<vmem>>, vector<1x32xf32>
    %57 = vector.broadcast %56 : vector<1x32xf32> to vector<20x32xf32>
    %58 = arith.addf %55, %57 : vector<20x32xf32>
    %cst_35 = arith.constant 0.000000e+00 : f32
    %59 = vector.broadcast %cst_35 : f32 to vector<20x32xf32>
    %60 = arith.maximumf %58, %59 : vector<20x32xf32>
    %c120 = arith.constant 120 : index
    %c0_36 = arith.constant 0 : index
    %61 = vector.load %arg3[%c120, %c0_36] : memref<920x160xf32, #tpu.memory_space<vmem>>, vector<32x72xf32>
    %cst_37 = arith.constant dense<0.000000e+00> : vector<20x72xf32>
    %62 = tpu.matmul %60, %61, %cst_37 {dimension_numbers = #tpu.dot_dimension_numbers<[1], [0], [0], [1], [0, 0, 1, 1], [], []>} : vector<20x32xf32>, vector<32x72xf32>, vector<20x72xf32> -> vector<20x72xf32>
    %c152 = arith.constant 152 : index
    %c0_38 = arith.constant 0 : index
    %63 = vector.load %arg3[%c152, %c0_38] : memref<920x160xf32, #tpu.memory_space<vmem>>, vector<1x72xf32>
    %64 = vector.broadcast %63 : vector<1x72xf32> to vector<20x72xf32>
    %65 = arith.addf %62, %64 : vector<20x72xf32>
    %66 = vector.extract_strided_slice %65 {offsets = [0, 0], sizes = [20, 32], strides = [1, 1]} : vector<20x72xf32> to vector<20x32xf32>
    %67 = vector.extract_strided_slice %65 {offsets = [0, 32], sizes = [20, 32], strides = [1, 1]} : vector<20x72xf32> to vector<20x32xf32>
    %68 = vector.extract_strided_slice %65 {offsets = [0, 64], sizes = [20, 8], strides = [1, 1]} : vector<20x72xf32> to vector<20x8xf32>
    %c160 = arith.constant 160 : index
    %c0_39 = arith.constant 0 : index
    %69 = vector.load %arg3[%c160, %c0_39] : memref<920x160xf32, #tpu.memory_space<vmem>>, vector<32x32xf32>
    %cst_40 = arith.constant dense<0.000000e+00> : vector<12x32xf32>
    %70 = tpu.matmul %53, %69, %cst_40 {dimension_numbers = #tpu.dot_dimension_numbers<[1], [0], [0], [1], [0, 0, 1, 1], [], []>} : vector<12x32xf32>, vector<32x32xf32>, vector<12x32xf32> -> vector<12x32xf32>
    %c192 = arith.constant 192 : index
    %c0_41 = arith.constant 0 : index
    %71 = vector.load %arg3[%c192, %c0_41] : memref<920x160xf32, #tpu.memory_space<vmem>>, vector<1x32xf32>
    %72 = vector.broadcast %71 : vector<1x32xf32> to vector<12x32xf32>
    %73 = arith.addf %70, %72 : vector<12x32xf32>
    %cst_42 = arith.constant 0.000000e+00 : f32
    %74 = vector.broadcast %cst_42 : f32 to vector<12x32xf32>
    %75 = arith.maximumf %73, %74 : vector<12x32xf32>
    %c200 = arith.constant 200 : index
    %c0_43 = arith.constant 0 : index
    %76 = vector.load %arg3[%c200, %c0_43] : memref<920x160xf32, #tpu.memory_space<vmem>>, vector<32x40xf32>
    %cst_44 = arith.constant dense<0.000000e+00> : vector<12x40xf32>
    %77 = tpu.matmul %75, %76, %cst_44 {dimension_numbers = #tpu.dot_dimension_numbers<[1], [0], [0], [1], [0, 0, 1, 1], [], []>} : vector<12x32xf32>, vector<32x40xf32>, vector<12x40xf32> -> vector<12x40xf32>
    %c232 = arith.constant 232 : index
    %c0_45 = arith.constant 0 : index
    %78 = vector.load %arg3[%c232, %c0_45] : memref<920x160xf32, #tpu.memory_space<vmem>>, vector<1x40xf32>
    %79 = vector.broadcast %78 : vector<1x40xf32> to vector<12x40xf32>
    %80 = arith.addf %77, %79 : vector<12x40xf32>
    %81 = vector.extract_strided_slice %80 {offsets = [0, 0], sizes = [12, 32], strides = [1, 1]} : vector<12x40xf32> to vector<12x32xf32>
    %82 = vector.extract_strided_slice %80 {offsets = [0, 32], sizes = [12, 8], strides = [1, 1]} : vector<12x40xf32> to vector<12x8xf32>
    %cst_46 = arith.constant dense<0.000000e+00> : vector<20x160xf32>
    %83 = tpu.matmul %68, %0, %cst_46 {dimension_numbers = #tpu.dot_dimension_numbers<[1], [0], [0], [1], [0, 0, 1, 1], [], []>} : vector<20x8xf32>, vector<8x160xf32>, vector<20x160xf32> -> vector<20x160xf32>
    %84 = arith.mulf %83, %1 : vector<20x160xf32>
    %cst_47 = arith.constant 1.000000e+00 : f32
    %85 = vector.broadcast %cst_47 : f32 to vector<12x20xf32>
    %cst_48 = arith.constant dense<0.000000e+00> : vector<12x160xf32>
    %86 = tpu.matmul %85, %84, %cst_48 {dimension_numbers = #tpu.dot_dimension_numbers<[1], [0], [0], [1], [0, 0, 1, 1], [], []>} : vector<12x20xf32>, vector<20x160xf32>, vector<12x160xf32> -> vector<12x160xf32>
    %cst_49 = arith.constant dense<0.000000e+00> : vector<12x160xf32>
    %87 = tpu.matmul %82, %0, %cst_49 {dimension_numbers = #tpu.dot_dimension_numbers<[1], [0], [0], [1], [0, 0, 1, 1], [], []>} : vector<12x8xf32>, vector<8x160xf32>, vector<12x160xf32> -> vector<12x160xf32>
    %88 = arith.addf %87, %86 : vector<12x160xf32>
    %89 = math.tanh %88 : vector<12x160xf32>
    %90 = math.exp %89 : vector<12x160xf32>
    %cst_50 = arith.constant dense<0.000000e+00> : vector<12x160xf32>
    %91 = tpu.matmul %90, %2, %cst_50 {dimension_numbers = #tpu.dot_dimension_numbers<[1], [0], [0], [1], [0, 0, 1, 1], [], []>} : vector<12x160xf32>, vector<160x160xf32>, vector<12x160xf32> -> vector<12x160xf32>
    %92 = arith.mulf %90, %6 : vector<12x160xf32>
    %93 = arith.divf %92, %91 : vector<12x160xf32>
    %cst_51 = arith.constant dense<0.000000e+00> : vector<160x32xf32>
    %94 = tpu.matmul %3, %67, %cst_51 {dimension_numbers = #tpu.dot_dimension_numbers<[1], [0], [0], [1], [0, 0, 1, 1], [], []>} : vector<160x20xf32>, vector<20x32xf32>, vector<160x32xf32> -> vector<160x32xf32>
    %95 = arith.mulf %94, %4 : vector<160x32xf32>
    %cst_52 = arith.constant dense<0.000000e+00> : vector<12x32xf32>
    %96 = tpu.matmul %93, %95, %cst_52 {dimension_numbers = #tpu.dot_dimension_numbers<[1], [0], [0], [1], [0, 0, 1, 1], [], []>} : vector<12x160xf32>, vector<160x32xf32>, vector<12x32xf32> -> vector<12x32xf32>
    %cst_53 = arith.constant dense<0.000000e+00> : vector<2x32xf32>
    %97 = tpu.matmul %7, %66, %cst_53 {dimension_numbers = #tpu.dot_dimension_numbers<[1], [0], [0], [1], [0, 0, 1, 1], [], []>} : vector<2x20xf32>, vector<20x32xf32>, vector<2x32xf32> -> vector<2x32xf32>
    %cst_54 = arith.constant dense<0.000000e+00> : vector<2x32xf32>
    %98 = tpu.matmul %8, %96, %cst_54 {dimension_numbers = #tpu.dot_dimension_numbers<[1], [0], [0], [1], [0, 0, 1, 1], [], []>} : vector<2x12xf32>, vector<12x32xf32>, vector<2x32xf32> -> vector<2x32xf32>
    %cst_55 = arith.constant dense<0.000000e+00> : vector<2x32xf32>
    %99 = tpu.matmul %8, %81, %cst_55 {dimension_numbers = #tpu.dot_dimension_numbers<[1], [0], [0], [1], [0, 0, 1, 1], [], []>} : vector<2x12xf32>, vector<12x32xf32>, vector<2x32xf32> -> vector<2x32xf32>
    %c0_56 = arith.constant 0 : index
    %c0_57 = arith.constant 0 : index
    %100 = vector.load %arg2[%c0_56, %c0_57] : memref<2x2xf32, #tpu.memory_space<vmem>>, vector<2x2xf32>
    %cst_58 = arith.constant 1.000000e+00 : f32
    %101 = vector.broadcast %cst_58 : f32 to vector<2x2xf32>
    %102 = arith.divf %101, %100 : vector<2x2xf32>
    %103 = vector.extract_strided_slice %102 {offsets = [0, 0], sizes = [2, 1], strides = [1, 1]} : vector<2x2xf32> to vector<2x1xf32>
    %104 = vector.extract_strided_slice %102 {offsets = [0, 1], sizes = [2, 1], strides = [1, 1]} : vector<2x2xf32> to vector<2x1xf32>
    %c240 = arith.constant 240 : index
    %c0_59 = arith.constant 0 : index
    %105 = vector.load %arg3[%c240, %c0_59] : memref<920x160xf32, #tpu.memory_space<vmem>>, vector<32x3xf32>
    %cst_60 = arith.constant dense<0.000000e+00> : vector<2x3xf32>
    %106 = tpu.matmul %97, %105, %cst_60 {dimension_numbers = #tpu.dot_dimension_numbers<[1], [0], [0], [1], [0, 0, 1, 1], [], []>} : vector<2x32xf32>, vector<32x3xf32>, vector<2x3xf32> -> vector<2x3xf32>
    %c272 = arith.constant 272 : index
    %c0_61 = arith.constant 0 : index
    %107 = vector.load %arg3[%c272, %c0_61] : memref<920x160xf32, #tpu.memory_space<vmem>>, vector<32x3xf32>
    %cst_62 = arith.constant dense<0.000000e+00> : vector<2x3xf32>
    %108 = tpu.matmul %98, %107, %cst_62 {dimension_numbers = #tpu.dot_dimension_numbers<[1], [0], [0], [1], [0, 0, 1, 1], [], []>} : vector<2x32xf32>, vector<32x3xf32>, vector<2x3xf32> -> vector<2x3xf32>
    %109 = arith.addf %106, %108 : vector<2x3xf32>
    %c344 = arith.constant 344 : index
    %c0_63 = arith.constant 0 : index
    %110 = vector.load %arg3[%c344, %c0_63] : memref<920x160xf32, #tpu.memory_space<vmem>>, vector<1x3xf32>
    %cst_64 = arith.constant 6.000000e+00 : f32
    %111 = vector.broadcast %cst_64 : f32 to vector<1x3xf32>
    %112 = arith.mulf %111, %110 : vector<1x3xf32>
    %113 = vector.broadcast %112 : vector<1x3xf32> to vector<2x3xf32>
    %114 = arith.addf %109, %113 : vector<2x3xf32>
    %115 = vector.broadcast %103 : vector<2x1xf32> to vector<2x3xf32>
    %116 = arith.mulf %114, %115 : vector<2x3xf32>
    %c304 = arith.constant 304 : index
    %c0_65 = arith.constant 0 : index
    %117 = vector.load %arg3[%c304, %c0_65] : memref<920x160xf32, #tpu.memory_space<vmem>>, vector<32x3xf32>
    %cst_66 = arith.constant dense<0.000000e+00> : vector<2x3xf32>
    %118 = tpu.matmul %99, %117, %cst_66 {dimension_numbers = #tpu.dot_dimension_numbers<[1], [0], [0], [1], [0, 0, 1, 1], [], []>} : vector<2x32xf32>, vector<32x3xf32>, vector<2x3xf32> -> vector<2x3xf32>
    %119 = vector.broadcast %104 : vector<2x1xf32> to vector<2x3xf32>
    %120 = arith.mulf %118, %119 : vector<2x3xf32>
    %121 = arith.addf %116, %120 : vector<2x3xf32>
    %c336 = arith.constant 336 : index
    %c0_67 = arith.constant 0 : index
    %122 = vector.load %arg3[%c336, %c0_67] : memref<920x160xf32, #tpu.memory_space<vmem>>, vector<1x3xf32>
    %123 = vector.broadcast %122 : vector<1x3xf32> to vector<2x3xf32>
    %124 = arith.addf %121, %123 : vector<2x3xf32>
    %c0_68 = arith.constant 0 : index
    %c0_69 = arith.constant 0 : index
    %125 = vector.load %arg4[%c0_68, %c0_69] : memref<2x3xf32, #tpu.memory_space<vmem>>, vector<2x3xf32>
    tpu.vector_store %arg4[%c0_68, %c0_69], %124 {strides = array<i32>} : memref<2x3xf32, #tpu.memory_space<vmem>>, vector<2x3xf32>,
    return
  }
}

</mosaic_0001>

<bundles_post_ra>
// kernel: _lambda_.1
= control target key start
LH: loop header
LB: loop body
LE: loop exit
PB: predicated region body
PF: predicated region fallthrough
CT: control target
= control target key end

     0   :  { %9 = vsyncpa [#allocation3], 0  ;;  %s3746_s0 = inlined_call_operand.vmem [shape: f32[20,32], index: 0, kind: input, shape index: {}]   ;;  %s3747_s1 = inlined_call_operand.vmem [shape: f32[12,32], index: 1, kind: input, shape index: {}]   ;;  %s3748_s2 = inlined_call_operand.vmem [shape: f32[2,2], index: 2, kind: input, shape index: {}]   ;;  %s3749_s3 = inlined_call_operand.hbm [shape: f32[920,160], index: 3, kind: input, shape index: {}]   ;;  %s3750_s4 = inlined_call_operand.hbm [shape: f32[2,3], index: 4, kind: output, shape index: {}]  }
   0x1   :  { %10 = vsyncpa [#allocation4], 0  ;;  %s21_s17 = sshll.u32 %s3749_s3, 4  ;;  %s2665_s18 = smov [#allocation2]   ;;  %s22_s17 = int_to_ptr.hbm [resolvable:$true] %s21_s17 }
   0x2   :  { %s23_s19 = sshll.u32 %s2665_s18, 4  ;;  %s2666_s20 = smov 256   ;;  %s24_s19 = int_to_ptr.vmem [resolvable:$true] %s23_s19 }
   0x3   :  { %s2667_s21 = smov 16  }
   0x4   :  { %29 = dma.hbm_to_vmem [thread:$0]  %s22_s17, 29440, %s24_s19, [#allocation3], %s2666_s20, %s2666_s20, %s2667_s21  }
   0x5   :  { %2661 = dma.done.wait [#allocation3], 29440  }
   0x6   :  { %2662 = vsyncadd [#allocation3], 4294937856  ;;  %v142_v0 = vld [vmem:[#allocation2 + $0x30] sm:$0xff]  ;;  %v141_v1 = vld [vmem:[#allocation2 + $0x20] sm:$0xff]  ;;  %vm144_vm0 = vcmask 261120   ;;  %s2668_s27 = smov 96  }
   0x7   :  { %166 = vmatpush.msra.mxu0 %v142_v0  ;;  %v140_v2 = vld [vmem:[#allocation2 + $0x10] sm:$0xff]  ;;  %v139_v3 = vld [vmem:[#allocation2] sm:$0xff]  ;;  %v135_v5 = vld [vmem:[%s3746_s0 + $0x8] sm:$0xff]  ;;  %s2670_s28 = smov 48   ;;  %s2671_s29 = smov 80   ;;  %vm223_vm1 = vcmask 64512  }
   0x8   :  { %v134_v4 = vld [vmem:[%s3746_s0] sm:$0xff]  ;;  %v136_v6 = vld [vmem:[%s3746_s0 + $0x10] sm:$0xf]  ;;  %s2669_s0 = smov 88   ;;  %v138_v20 = vld [vmem:[%s3747_s1 + $0x8] sm:$0xf] }
   0x9   :  { %167 = vmatpush.msra.mxu0 %v141_v1  ;;  %v143_v7 = vld [vmem:[#allocation2 + $0x40] ss:$0 sm:$0xff]  ;;  %v182_v11 = vld [vmem:[#allocation2 + $0x70] sm:$0xff]  ;;  %v2748_v22 = vld [vmem:[#allocation2 + $0x2c8] sm:$0xff]  ;;  %vm292_vm2 = vcmask 1043456   ;;  %vm288_vm3 = vcmask 162816  }
   0xa   :  { %v183_v10 = vld [vmem:[#allocation2 + $0x80] sm:$0xff]  ;;  %v180_v13 = vld [vmem:[#allocation2 + $0x50] sm:$0xff]  ;;  %2403 = vmatpush.msra.mxu3 %v2748_v22  ;;  %v73_v34 = vld [vmem:[#allocation2 + $0x3f8] sm:$0xff]  ;;  %v3751_v57 = vmov 1.0   ;;  %s2233_s13 = sshll.u32 %s3750_s4, 4  ;;  %s2234_s13 = int_to_ptr.hbm [resolvable:$true] %s2233_s13 }
   0xb   :  { %168 = vmatpush.msra.mxu0 %v140_v2  ;;  %203 = vmatpush.msra.mxu1 %v183_v10  ;;  %v181_v12 = vld [vmem:[#allocation2 + $0x60] sm:$0xff]  ;;  %v71_v35 = vld [vmem:[#allocation2 + $0x3e8] sm:$0xff]  ;;  %v69_v36 = vld [vmem:[#allocation2 + $0x3d8] sm:$0xff] }
   0xc   :  { %v137_v19 = vld [vmem:[%s3747_s1] sm:$0xff]  ;;  %v67_v37 = vld [vmem:[#allocation2 + $0x3c8] sm:$0xff]  ;;  %v2771_v38 = vld [vmem:[#allocation2 + $0x2f0] sm:$0xf]  ;;  %s2673_s1 = smov 64  }
   0xd   :  { %169 = vmatpush.msra.mxu0 %v139_v3  ;;  %204 = vmatpush.msra.mxu1 %v182_v11  ;;  %v2746_v21 = vld [vmem:[#allocation2 + $0x2c0] sm:$0xff]  ;;  %v2773_v39 = vld [vmem:[#allocation2 + $0x2f8] sm:$0xf]  ;;  %v2777_v44 = vld [vmem:[#allocation2 + $0x2e8] sm:$0xff] }
   0xe   :  { %2243 = vmatmul.msk.f32.vlgmr.msra.gmra.mxu0 %vm144_vm0, %v134_v4  ;;  %245 = vmatpush.msra.mxu2 %v2746_v21  ;;  %v65_v40 = vld [vmem:[#allocation2 + $0x3b8] sm:$0xff]  ;;  %v2775_v41 = vld [vmem:[#allocation2 + $0x2e0] sm:$0xff]  ;;  %v2781_v47 = vld [vmem:[#allocation2 + $0x3a8] sm:$0xff] }
   0xf   :  { %205 = vmatpush.msra.mxu1 %v181_v12  ;;  %404 = vmatpush.msrb.mxu0 %v2748_v22  ;;  %v2783_v49 = vld [vmem:[#allocation2 + $0x2d0] sm:$0xff]  ;;  %v2785_v50 = vld [vmem:[#allocation2 + $0x2d8] sm:$0xff]  ;;  %v2802_v58 = vld [vmem:[#allocation2 + $0x420] sm:$0xff] }
  0x10   :  { %378 = vmatpush.msrb.mxu3 %v2746_v21  ;;  %v2794_v55 = vld [vmem:[#allocation2 + $0x430] sm:$0xff]  ;;  %v2804_v59 = vld [vmem:[#allocation2 + $0x3e0] sm:$0xff]  ;;  %v2842_v3 = vld [vmem:[#allocation2 + $0x398] sm:$0xff] }
  0x11   :  { %206 = vmatpush.msra.mxu1 %v180_v13  ;;  %v2796_v56 = vld [vmem:[#allocation2 + $0x3f0] sm:$0xff]  ;;  %v2814_v62 = vld [vmem:[#allocation2 + $0x400] sm:$0xff]  ;;  %v2866_v11 = vld [vmem:[#allocation2 + $0x358] sm:$0xff] }
  0x12   :  { %2246 = vmatmul.msk.f32.vlgmr.msra.gmra.mxu1 %vm144_vm0, %v137_v19  ;;  %v2808_v60 = vld [vmem:[#allocation2 + $0x410] sm:$0xff]  ;;  %v2816_v63 = vld [vmem:[#allocation2 + $0x3c0] sm:$0xff]  ;;  %v2872_v13 = vld [vmem:[#allocation2 + $0x348] sm:$0xff] }
  0x13   :  { %271 = vmatpush.msrb.mxu1 %v2748_v22  ;;  %v2810_v61 = vld [vmem:[#allocation2 + $0x3d0] sm:$0xff]  ;;  %v2828_v1 = vld [vmem:[#allocation2 + $0x3a0] sm:$0xff]  ;;  %v2890_v19 = vld [vmem:[#allocation2 + $0x318] sm:$0xff] }
  0x14   :  { %v2820_v0 = vld [vmem:[#allocation2 + $0x3b0] sm:$0xff]  ;;  %v2846_v4 = vld [vmem:[#allocation2 + $0x380] sm:$0xff]  ;;  %3797 = vst [vmem:[#allocation10_spill] sm:$0xff] %v2890_v19 }
  0x15   :  { %v2840_v2 = vld [vmem:[#allocation2 + $0x390] sm:$0xff]  ;;  %v2870_v12 = vld [vmem:[#allocation2 + $0x340] sm:$0xff] }
  0x16   :  { %2244 = vmatmul.msk.f32.gmra.mxu0 %vm144_vm0, %v135_v5  ;;  %v2848_v5 = vld [vmem:[#allocation2 + $0x388] sm:$0xff]  ;;  %v2864_v10 = vld [vmem:[#allocation2 + $0x350] sm:$0xff] }
  0x1a   :  { %2247 = vmatmul.msk.f32.gmra.mxu1 %vm144_vm0, %v138_v20  ;;  %v2894_v20 = vld [vmem:[#allocation2 + $0x300] sm:$0xff] }
  0x1e   :  { %2245 = vmatmul.msk.f32.gmra.mxu0 %vm144_vm0, %v136_v6  ;;  %v2852_v6 = vld [vmem:[#allocation2 + $0x370] sm:$0xff] }
  0x8b   :  { %v171_v8 = vpop.f32.mrf.mxu0 }
  0x8c   :  { %v2717_v9 = vadd.f32 %v171_v8, %v143_v7  ;;  %v2858_v8 = vld [vmem:[#allocation2 + $0x360] sm:$0xff] }
  0x8e   :  { %217 = vrot.lane.b32.xlu1 %v2717_v9, %s2668_s27 }
  0x8f   :  { %v2767_v29 = vpop.f32.mrf.mxu1 }
  0x93   :  { %v174_v14 = vpop.f32.mrf.mxu0 }
  0x94   :  { %v2721_v15 = vadd.f32 %v174_v14, %v143_v7  ;;  %v2876_v14 = vld [vmem:[#allocation2 + $0x330] sm:$0xff] }
  0x96   :  { %353 = vrot.lane.b32.xlu2 %v2721_v15, %s2669_s0  ;;  %219 = vrot.lane.b32.xlu0 %v2721_v15, %s2668_s27  ;;  %v2426_v18 = vpack.i.bf16 %v2717_v9, %v2721_v15 }
  0x97   :  { %351 = vrot.lane.b32.xlu1 %v2717_v9, %s2669_s0  ;;  %v2769_v31 = vpop.f32.mrf.mxu1 }
  0x9b   :  { %v177_v16 = vpop.f32.mrf.mxu0 }
  0x9c   :  { %v2727_v17 = vadd.f32 %v177_v16, %v143_v7  ;;  %v2854_v7 = vld [vmem:[#allocation2 + $0x378] sm:$0xff]  ;;  %v2882_v16 = vld [vmem:[#allocation2 + $0x320] sm:$0xff] }
  0x9e   :  { %355 = vrot.lane.b32.xlu2 %v2727_v17, %s2669_s0  ;;  %221 = vrot.lane.b32.xlu0 %v2727_v17, %s2668_s27 }
  0x9f   :  { %864 = vrot.lane.b32.xlu1 %v2721_v15, %s2670_s28 }
  0xa6   :  { %866 = vrot.lane.b32.xlu2 %v2727_v17, %s2670_s28  ;;  %862 = vrot.lane.b32.xlu0 %v2717_v9, %s2670_s28 }
  0xa7   :  { %2427 = vrot.lane.b32.xlu1 %v2426_v18, %s2671_s29  ;;  %v2888_v18 = vld [vmem:[#allocation2 + $0x310] sm:$0xff] }
  0xae   :  { %1214 = vrot.lane.b32.xlu0 %v2727_v17, %s2671_s29 }
  0xf0   :  { %v354_v26 = vpop.permute.xlu2 %353 }
  0xf8   :  { %v356_v28 = vpop.permute.xlu2 %355 }
 0x100   :  { %v218_v23 = vpop.permute.xlu1 %217 }
 0x101   :  { %2248 = vmatmul.msk.f32.vlgmr.msra.gmra.mxu2 %vm223_vm1, %v218_v23  ;;  %2251 = vmatmul.msk.f32.vlgmr.msrb.gmra.mxu1 %vm223_vm1, %v218_v23  ;;  %v2896_v23 = vld [vmem:[#allocation2 + $0x308] sm:$0xff] }
 0x102   :  { %3798 = vst [vmem:[#allocation11_spill] sm:$0xff] %v2896_v23 }
 0x108   :  { %v220_v24 = vpop.permute.xlu0 %219 }
 0x109   :  { %v352_v25 = vpop.permute.xlu1 %351  ;;  %2249 = vmatmul.msk.f32.gmra.mxu2 %vm223_vm1, %v220_v24  ;;  %2252 = vmatmul.msk.f32.vlgmr.msra.gmra.mxu3 %vm223_vm1, %v220_v24  ;;  %v2898_v24 = vld [vmem:[#allocation2 + $0x438] sm:$0xff] }
 0x10a   :  { %2265 = vmatmul.msk.f32.vlgmr.msrb.gmra.mxu0 %vm223_vm1, %v352_v25  ;;  %494 = vmatpush.msra.mxu3 %v73_v34 }
 0x10b   :  { %532 = vmatpush.msra.mxu0 %v2898_v24 }
 0x10c   :  { %495 = vmatpush.msra.mxu3 %v71_v35 }
 0x10e   :  { %496 = vmatpush.msra.mxu3 %v69_v36 }
 0x110   :  { %v222_v27 = vpop.permute.xlu0 %221  ;;  %497 = vmatpush.msra.mxu3 %v67_v37 }
 0x111   :  { %2250 = vmatmul.msk.f32.gmra.mxu2 %vm223_vm1, %v222_v27  ;;  %2253 = vmatmul.msk.f32.gmra.mxu3 %vm223_vm1, %v222_v27  ;;  %v2910_v27 = vld [vmem:[#allocation2 + $0x408] sm:$0xff] }
 0x112   :  { %2266 = vmatmul.msk.f32.gmra.mxu0 %vm223_vm1, %v354_v26  ;;  %498 = vmatpush.msra.mxu3 %v65_v40 }
 0x114   :  { %499 = vmatpush.msra.mxu3 %v2781_v47 }
 0x116   :  { %500 = vmatpush.msra.mxu3 %v2842_v3 }
 0x118   :  { %501 = vmatpush.msra.mxu3 %v2848_v5 }
 0x119   :  { %2262 = vmatmul.msk.f32.vlgmr.msrb.gmra.mxu3 %vm223_vm1, %v352_v25  ;;  %v2903_v25 = vld [vmem:[#allocation2 + $0x428] sm:$0xff] }
 0x11a   :  { %2267 = vmatmul.msk.f32.gmra.mxu0 %vm223_vm1, %v356_v28  ;;  %502 = vmatpush.msra.mxu3 %v2854_v7 }
 0x11b   :  { %533 = vmatpush.msra.mxu0 %v2903_v25 }
 0x121   :  { %2263 = vmatmul.msk.f32.gmra.mxu3 %vm223_vm1, %v354_v26  ;;  %v2907_v26 = vld [vmem:[#allocation2 + $0x418] sm:$0xff] }
 0x122   :  { %534 = vmatpush.msra.mxu0 %v2907_v26 }
 0x124   :  { %535 = vmatpush.msra.mxu0 %v2910_v27 }
 0x129   :  { %2264 = vmatmul.msk.f32.gmra.mxu3 %vm223_vm1, %v356_v28 }
 0x17e   :  { %v273_v48 = vpop.f32.mrf.mxu1 }
 0x17f   :  { %v283_v54 = vmul.f32 %v273_v48, %v2785_v50 }
 0x184   :  { %v247_v30 = vpop.f32.mrf.mxu2 }
 0x185   :  { %v282_v53 = vmul.f32 %v247_v30, %v2783_v49 }
 0x18c   :  { %v250_v32 = vpop.f32.mrf.mxu2  ;;  %v276_v33 = vpop.f32.mrf.mxu3 }
 0x18d   :  { %v284_v51 = vmul.f32 %v250_v32, %v2775_v41  ;;  %v285_v52 = vmul.f32 %v276_v33, %v2777_v44  ;;  %v406_v33 = vpop.f32.mrf.mxu0 }
 0x194   :  { %v253_v42 = vpop.f32.mrf.mxu2  ;;  %v279_v43 = vpop.f32.mrf.mxu3 }
 0x195   :  { %v286_v45 = vmul.f32 %v253_v42, %v2771_v38  ;;  %v287_v46 = vmul.f32 %v279_v43, %v2773_v39 }
 0x197   :  { %2254 = vmatpush.msk.msra.mxu1 %vm292_vm2, %v286_v45  ;;  %2258 = vmatpush.msk.msrb.mxu2 %vm292_vm2, %v287_v46  ;;  %v409_v45 = vpop.f32.mrf.mxu0 }
 0x199   :  { %313 = vmatpush.msra.mxu1 %v284_v51  ;;  %339 = vmatpush.msrb.mxu2 %v285_v52 }
 0x19b   :  { %314 = vmatpush.msra.mxu1 %v282_v53  ;;  %340 = vmatpush.msrb.mxu2 %v283_v54 }
 0x19c   :  { %2255 = vmatmul.msk.f32.vlgmr.msra.gmra.mxu1 %vm288_vm3, %v3751_v57  ;;  %2259 = vmatmul.msk.f32.vlgmr.msrb.gmra.mxu2 %vm288_vm3, %v3751_v57  ;;  %v380_v28 = vpop.f32.mrf.mxu3 }
 0x19d   :  { %480 = vmatpush.msra.mxu2 %v2794_v55  ;;  %442 = vmatpush.msrb.mxu1 %v2796_v56 }
 0x19f   :  { %481 = vmatpush.msra.mxu2 %v2802_v58  ;;  %443 = vmatpush.msrb.mxu1 %v2804_v59 }
 0x1a1   :  { %482 = vmatpush.msra.mxu2 %v2808_v60  ;;  %444 = vmatpush.msrb.mxu1 %v2810_v61 }
 0x1a3   :  { %483 = vmatpush.msra.mxu2 %v2814_v62  ;;  %445 = vmatpush.msrb.mxu1 %v2816_v63 }
 0x1a4   :  { %2256 = vmatmul.msk.f32.gmra.mxu1 %vm288_vm3, %v3751_v57  ;;  %2260 = vmatmul.msk.f32.gmra.mxu2 %vm288_vm3, %v3751_v57  ;;  %v383_v34 = vpop.f32.mrf.mxu3 }
 0x1a5   :  { %2274 = vmatpush.msk.msrb.mxu2 %vm292_vm2, %v2727_v17  ;;  %446 = vmatpush.msrb.mxu1 %v2820_v0  ;;  %v2884_v17 = vld [vmem:[#allocation2 + $0x328] sm:$0xff] }
 0x1a6   :  { %3796 = vst [vmem:[#allocation9_spill] sm:$0xff] %v2884_v17 }
 0x1a7   :  { %718 = vmatpush.msrb.mxu2 %v2721_v15  ;;  %447 = vmatpush.msrb.mxu1 %v2828_v1  ;;  %v2878_v15 = vld [vmem:[#allocation2 + $0x338] sm:$0xff] }
 0x1a8   :  { %3795 = vst [vmem:[#allocation8_spill] sm:$0xff] %v2878_v15 }
 0x1a9   :  { %719 = vmatpush.msrb.mxu2 %v2717_v9  ;;  %448 = vmatpush.msrb.mxu1 %v2840_v2  ;;  %v2860_v9 = vld [vmem:[#allocation2 + $0x368] sm:$0xff] }
 0x1aa   :  { %503 = vmatpush.msra.mxu3 %v2860_v9 }
 0x1ab   :  { %449 = vmatpush.msrb.mxu1 %v2846_v4 }
 0x1ac   :  { %2257 = vmatmul.msk.f32.gmra.mxu1 %vm288_vm3, %v3751_v57  ;;  %2261 = vmatmul.msk.f32.gmra.mxu2 %vm288_vm3, %v3751_v57  ;;  %v386_v51 = vpop.f32.mrf.mxu3 }
 0x1ad   :  { %450 = vmatpush.msrb.mxu1 %v2852_v6  ;;  %504 = vmatpush.msra.mxu3 %v2866_v11 }
 0x1af   :  { %451 = vmatpush.msrb.mxu1 %v2858_v8  ;;  %505 = vmatpush.msra.mxu3 %v2872_v13 }
 0x1b1   :  { %452 = vmatpush.msrb.mxu1 %v2864_v10  ;;  %506 = vmatpush.msra.mxu3 %v2878_v15 }
 0x1b3   :  { %453 = vmatpush.msrb.mxu1 %v2870_v12  ;;  %507 = vmatpush.msra.mxu3 %v2884_v17  ;;  %v3130_v17 = vld [vmem:[#allocation2 + $0x630] sm:$0xff] }
 0x1b4   :  { %3824 = vst [vmem:[#allocation36_spill] sm:$0xff] %v3130_v17 }
 0x1b5   :  { %454 = vmatpush.msrb.mxu1 %v2876_v14  ;;  %508 = vmatpush.msra.mxu3 %v2890_v19 }
 0x1b7   :  { %455 = vmatpush.msrb.mxu1 %v2882_v16  ;;  %509 = vmatpush.msra.mxu3 %v2896_v23 }
 0x1b9   :  { %456 = vmatpush.msrb.mxu1 %v2888_v18  ;;  %889 = vmatpush.msrb.mxu3 %v2746_v21 }
 0x1bb   :  { %457 = vmatpush.msrb.mxu1 %v2894_v20 }
 0x219   :  { %v316_v30 = vpop.f32.mrf.mxu1 }
 0x21a   :  { %v381_v32 = vadd.f32 %v380_v28, %v316_v30 }
 0x21c   :  { %2439 = vtanh.f32 %v381_v32 }
 0x21f   :  { %v342_v35 = vpop.f32.mrf.mxu2 }
 0x220   :  { %v407_v36 = vadd.f32 %v406_v33, %v342_v35 }
 0x221   :  { %v319_v37 = vpop.f32.mrf.mxu1 }
 0x222   :  { %v2440_v40 = vpop.eup %2439  ;;  %2441 = vtanh.f32 %v407_v36  ;;  %v384_v42 = vadd.f32 %v383_v34, %v319_v37  ;;  %v412_v34 = vpop.f32.mrf.mxu0 }
 0x223   :  { %v421_v43 = vmul.f32 1.442695, %v2440_v40 }
 0x224   :  { %2443 = vtanh.f32 %v384_v42 }
 0x225   :  { %2445 = vpow2.f32 %v421_v43 }
 0x227   :  { %v345_v48 = vpop.f32.mrf.mxu2 }
 0x228   :  { %v2442_v46 = vpop.eup %2441  ;;  %v410_v53 = vadd.f32 %v409_v45, %v345_v48 }
 0x229   :  { %v423_v52 = vmul.f32 1.442695, %v2442_v46  ;;  %v322_v54 = vpop.f32.mrf.mxu1 }
 0x22a   :  { %v2444_v28 = vpop.eup %2443  ;;  %v387_v30 = vadd.f32 %v386_v51, %v322_v54  ;;  %v3019_v54 = vld [vmem:[#allocation2 + $0x500] sm:$0xff] }
 0x22b   :  { %v2913_v32 = vpop.eup %2445  ;;  %2447 = vpow2.f32 %v423_v52  ;;  %v425_v33 = vmul.f32 1.442695, %v2444_v28  ;;  %3811 = vst [vmem:[#allocation24_spill] sm:$0xff] %v3019_v54 }
 0x22c   :  { %2449 = vtanh.f32 %v410_v53  ;;  %458 = vmatmul.f32.vlgmr.msrb.gmra.mxu1 %v2913_v32  ;;  %510 = vmatmul.f32.vlgmr.msra.gmra.mxu3 %v2913_v32  ;;  %v3015_v53 = vld [vmem:[#allocation2 + $0x4f0] sm:$0xff] }
 0x22d   :  { %2451 = vpow2.f32 %v425_v33  ;;  %3810 = vst [vmem:[#allocation23_spill] sm:$0xff] %v3015_v53 }
 0x22e   :  { %2453 = vtanh.f32 %v387_v30  ;;  %v3025_v30 = vld [vmem:[#allocation2 + $0x510] sm:$0xff] }
 0x22f   :  { %v348_v35 = vpop.f32.mrf.mxu2  ;;  %3812 = vst [vmem:[#allocation25_spill] sm:$0xff] %v3025_v30 }
 0x230   :  { %v413_v37 = vadd.f32 %v412_v34, %v348_v35  ;;  %v3031_v35 = vld [vmem:[#allocation2 + $0x520] sm:$0xff] }
 0x231   :  { %v2917_v36 = vpop.eup %2447  ;;  %3813 = vst [vmem:[#allocation26_spill] sm:$0xff] %v3031_v35 }
 0x232   :  { %v2450_v40 = vpop.eup %2449  ;;  %2268 = vmatmul.msk.f32.vlgmr.msra.gmra.mxu2 %vm144_vm0, %v2917_v36  ;;  %2271 = vmatmul.msk.f32.vlgmr.msra.gmra.mxu0 %vm144_vm0, %v2917_v36  ;;  %2455 = vtanh.f32 %v413_v37 }
 0x233   :  { %v2923_v42 = vpop.eup %2451  ;;  %v427_v43 = vmul.f32 1.442695, %v2450_v40  ;;  %1054 = vmatpush.msra.mxu2 %v2796_v56 }
 0x234   :  { %v2454_v45 = vpop.eup %2453  ;;  %461 = vmatmul.f32.gmra.mxu1 %v2923_v42  ;;  %513 = vmatmul.f32.gmra.mxu3 %v2923_v42 }
 0x235   :  { %2457 = vpow2.f32 %v427_v43  ;;  %v429_v46 = vmul.f32 1.442695, %v2454_v45  ;;  %1055 = vmatpush.msra.mxu2 %v2804_v59  ;;  %v3039_v43 = vld [vmem:[#allocation2 + $0x530] sm:$0xff] }
 0x236   :  { %3814 = vst [vmem:[#allocation27_spill] sm:$0xff] %v3039_v43 }
 0x237   :  { %2459 = vpow2.f32 %v429_v46  ;;  %1056 = vmatpush.msra.mxu2 %v2810_v61  ;;  %v2952_v61 = vpop.permute.xlu0 %862 }
 0x238   :  { %v2456_v48 = vpop.eup %2455 }
 0x239   :  { %1057 = vmatpush.msra.mxu2 %v2816_v63  ;;  %v431_v51 = vmul.f32 1.442695, %v2456_v48  ;;  %v2958_v63 = vld [vmem:[#allocation2 + $0x440] sm:$0xff] }
 0x23a   :  { %3799 = vst [vmem:[#allocation12_spill] sm:$0xff] %v2958_v63  ;;  %v3045_v48 = vld [vmem:[#allocation2 + $0x540] sm:$0xff] }
 0x23b   :  { %v2931_v52 = vpop.eup %2457  ;;  %1058 = vmatpush.msra.mxu2 %v2820_v0  ;;  %2461 = vpow2.f32 %v431_v51  ;;  %v2964_v0 = vpop.permute.xlu1 %864  ;;  %3815 = vst [vmem:[#allocation28_spill] sm:$0xff] %v3045_v48 }
 0x23c   :  { %2269 = vmatmul.msk.f32.gmra.mxu2 %vm144_vm0, %v2931_v52  ;;  %2272 = vmatmul.msk.f32.gmra.mxu0 %vm144_vm0, %v2931_v52 }
 0x23d   :  { %v2938_v56 = vpop.eup %2459  ;;  %1059 = vmatpush.msra.mxu2 %v2828_v1  ;;  %v2970_v1 = vld [vmem:[#allocation2 + $0x450] sm:$0xff] }
 0x23e   :  { %464 = vmatmul.f32.gmra.mxu1 %v2938_v56  ;;  %516 = vmatmul.f32.gmra.mxu3 %v2938_v56  ;;  %3800 = vst [vmem:[#allocation13_spill] sm:$0xff] %v2970_v1 }
 0x23f   :  { %1060 = vmatpush.msra.mxu2 %v2840_v2  ;;  %v2975_v2 = vpop.permute.xlu2 %866 }
 0x241   :  { %1061 = vmatpush.msra.mxu2 %v2846_v4  ;;  %v2945_v59 = vpop.eup %2461  ;;  %v2979_v4 = vld [vmem:[#allocation2 + $0x460] sm:$0xff] }
 0x242   :  { %3801 = vst [vmem:[#allocation14_spill] sm:$0xff] %v2979_v4 }
 0x243   :  { %1062 = vmatpush.msra.mxu2 %v2852_v6  ;;  %v2983_v6 = vld [vmem:[#allocation2 + $0x470] sm:$0xff] }
 0x244   :  { %2270 = vmatmul.msk.f32.gmra.mxu2 %vm144_vm0, %v2945_v59  ;;  %2273 = vmatmul.msk.f32.gmra.mxu0 %vm144_vm0, %v2945_v59  ;;  %3802 = vst [vmem:[#allocation15_spill] sm:$0xff] %v2983_v6 }
 0x245   :  { %1063 = vmatpush.msra.mxu2 %v2858_v8  ;;  %v2987_v8 = vld [vmem:[#allocation2 + $0x480] sm:$0xff] }
 0x246   :  { %2298 = vmatmul.msk.f32.vlgmr.msrb.gmra.mxu3 %vm223_vm1, %v2952_v61  ;;  %3803 = vst [vmem:[#allocation16_spill] sm:$0xff] %v2987_v8 }
 0x247   :  { %1064 = vmatpush.msra.mxu2 %v2864_v10  ;;  %v2991_v10 = vld [vmem:[#allocation2 + $0x490] sm:$0xff] }
 0x248   :  { %3804 = vst [vmem:[#allocation17_spill] sm:$0xff] %v2991_v10 }
 0x249   :  { %1065 = vmatpush.msra.mxu2 %v2870_v12  ;;  %v2995_v12 = vld [vmem:[#allocation2 + $0x4a0] sm:$0xff] }
 0x24a   :  { %3805 = vst [vmem:[#allocation18_spill] sm:$0xff] %v2995_v12 }
 0x24b   :  { %1066 = vmatpush.msra.mxu2 %v2876_v14  ;;  %v2999_v14 = vld [vmem:[#allocation2 + $0x4b0] sm:$0xff] }
 0x24c   :  { %2275 = vmatmul.msk.f32.vlgmr.msrb.gmra.mxu2 %vm288_vm3, %v2958_v63  ;;  %3806 = vst [vmem:[#allocation19_spill] sm:$0xff] %v2999_v14  ;;  %v3118_v63 = vld [vmem:[#allocation2 + $0x650] sm:$0xff] }
 0x24d   :  { %1067 = vmatpush.msra.mxu2 %v2882_v16  ;;  %v3003_v16 = vld [vmem:[#allocation2 + $0x4c0] sm:$0xff]  ;;  %3822 = vst [vmem:[#allocation34_spill] sm:$0xff] %v3118_v63 }
 0x24e   :  { %2299 = vmatmul.msk.f32.gmra.mxu3 %vm223_vm1, %v2964_v0  ;;  %3807 = vst [vmem:[#allocation20_spill] sm:$0xff] %v3003_v16 }
 0x24f   :  { %1068 = vmatpush.msra.mxu2 %v2888_v18  ;;  %v3007_v18 = vld [vmem:[#allocation2 + $0x4d0] sm:$0xff] }
 0x250   :  { %3808 = vst [vmem:[#allocation21_spill] sm:$0xff] %v3007_v18 }
 0x251   :  { %1069 = vmatpush.msra.mxu2 %v2894_v20  ;;  %v3011_v20 = vld [vmem:[#allocation2 + $0x4e0] sm:$0xff] }
 0x252   :  { %3809 = vst [vmem:[#allocation22_spill] sm:$0xff] %v3011_v20 }
 0x254   :  { %2276 = vmatmul.msk.f32.gmra.mxu2 %vm288_vm3, %v2970_v1 }
 0x256   :  { %2300 = vmatmul.msk.f32.gmra.mxu3 %vm223_vm1, %v2975_v2 }
 0x25c   :  { %2277 = vmatmul.msk.f32.gmra.mxu2 %vm288_vm3, %v2979_v4  ;;  %v3114_v4 = vld [vmem:[#allocation2 + $0x660] sm:$0xff] }
 0x25d   :  { %3821 = vst [vmem:[#allocation33_spill] sm:$0xff] %v3114_v4 }
 0x264   :  { %2278 = vmatmul.msk.f32.gmra.mxu2 %vm288_vm3, %v2983_v6 }
 0x26c   :  { %2279 = vmatmul.msk.f32.gmra.mxu2 %vm288_vm3, %v2987_v8 }
 0x274   :  { %2280 = vmatmul.msk.f32.gmra.mxu2 %vm288_vm3, %v2991_v10 }
 0x27c   :  { %2281 = vmatmul.msk.f32.gmra.mxu2 %vm288_vm3, %v2995_v12 }
 0x284   :  { %2282 = vmatmul.msk.f32.gmra.mxu2 %vm288_vm3, %v2999_v14 }
 0x28c   :  { %2283 = vmatmul.msk.f32.gmra.mxu2 %vm288_vm3, %v3003_v16 }
 0x294   :  { %2284 = vmatmul.msk.f32.gmra.mxu2 %vm288_vm3, %v3007_v18 }
 0x29c   :  { %2285 = vmatmul.msk.f32.gmra.mxu2 %vm288_vm3, %v3011_v20 }
 0x2a4   :  { %2286 = vmatmul.msk.f32.gmra.mxu2 %vm288_vm3, %v3015_v53  ;;  %v3069_v53 = vld [vmem:[#allocation2 + $0x570] sm:$0xff] }
 0x2a5   :  { %3819 = vst [vmem:[#allocation31_spill] sm:$0xff] %v3069_v53 }
 0x2a9   :  { %v459_v6 = vpop.f32.mrf.mxu1 }
 0x2ac   :  { %2287 = vmatmul.msk.f32.gmra.mxu2 %vm288_vm3, %v3019_v54 }
 0x2af   :  { %v3023_v28 = vpop.f32.mrf.mxu3 }
 0x2b1   :  { %v462_v16 = vpop.f32.mrf.mxu1 }
 0x2b4   :  { %2288 = vmatmul.msk.f32.gmra.mxu2 %vm288_vm3, %v3025_v30 }
 0x2b5   :  { %v485_v33 = vpop.f32.mrf.mxu2 }
 0x2b7   :  { %v3029_v34 = vpop.f32.mrf.mxu3 }
 0x2bc   :  { %2289 = vmatmul.msk.f32.gmra.mxu2 %vm288_vm3, %v3031_v35  ;;  %v3051_v35 = vld [vmem:[#allocation2 + $0x550] sm:$0xff] }
 0x2bd   :  { %3816 = vst [vmem:[#allocation29_spill] sm:$0xff] %v3051_v35 }
 0x2bf   :  { %v3035_v37 = vpop.f32.mrf.mxu2 }
 0x2c1   :  { %v3037_v40 = vpop.f32.mrf.mxu3 }
 0x2c4   :  { %2290 = vmatmul.msk.f32.gmra.mxu2 %vm288_vm3, %v3039_v43  ;;  %v3057_v43 = vld [vmem:[#allocation2 + $0x560] sm:$0xff] }
 0x2c5   :  { %3817 = vst [vmem:[#allocation30_spill] sm:$0xff] %v3057_v43 }
 0x2c7   :  { %v3043_v45 = vpop.f32.mrf.mxu2 }
 0x2c9   :  { %v891_v46 = vpop.f32.mrf.mxu3 }
 0x2cc   :  { %2291 = vmatmul.msk.f32.gmra.mxu2 %vm288_vm3, %v3045_v48  ;;  %v926_v48 = vmul.f32 %v891_v46, %v2783_v49  ;;  %v3082_v49 = vpop.permute.xlu1 %2427 }
 0x2cf   :  { %v3049_v51 = vpop.f32.mrf.mxu2 }
 0x2d1   :  { %v894_v57 = vpop.f32.mrf.mxu3 }
 0x2d2   :  { %v928_v54 = vmul.f32 %v894_v57, %v2775_v41  ;;  %v184_v41 = vld [vmem:[#allocation2 + $0x90] ss:$0 sm:$0xff]  ;;  %v3089_v57 = vpop.permute.xlu0 %1214 }
 0x2d4   :  { %2292 = vmatmul.msk.f32.gmra.mxu2 %vm288_vm3, %v3051_v35  ;;  %v3818_v35 = vmov 1.0  }
 0x2d7   :  { %v3055_v12 = vpop.f32.mrf.mxu2 }
 0x2d9   :  { %v897_v30 = vpop.f32.mrf.mxu3 }
 0x2da   :  { %v930_v10 = vmul.f32 %v897_v30, %v2771_v38 }
 0x2dc   :  { %2293 = vmatmul.msk.f32.gmra.mxu2 %vm288_vm3, %v3057_v43  ;;  %2304 = vmatpush.msk.msra.mxu3 %vm292_vm2, %v930_v10 }
 0x2de   :  { %952 = vmatpush.msra.mxu3 %v928_v54 }
 0x2df   :  { %v3065_v8 = vpop.f32.mrf.mxu2 }
 0x2e0   :  { %953 = vmatpush.msra.mxu3 %v926_v48 }
 0x2e1   :  { %2305 = vmatmul.msk.f32.vlgmr.msra.gmra.mxu3 %vm288_vm3, %v3818_v35 }
 0x2e2   :  { %1005 = vmatpush.msrb.mxu3 %v2746_v21  ;;  %v3085_v21 = vadd.f32 %v2767_v29, %v184_v41  ;;  %v3102_v29 = vadd.f32 %v2769_v31, %v184_v41  ;;  %v537_v31 = vpop.f32.mrf.mxu0  ;;  %v3112_v41 = vld [vmem:[#allocation2 + $0x670] sm:$0xff] }
 0x2e3   :  { %3820 = vst [vmem:[#allocation32_spill] sm:$0xff] %v3112_v41  ;;  %v3122_v23 = vadd.f32 %v537_v31, %v3023_v28  ;;  %v3150_v31 = vld [vmem:[#allocation2 + $0x600] sm:$0xff] }
 0x2e4   :  { %1089 = vmatpush.msra.mxu3 %v2794_v55  ;;  %2294 = vmatmul.msk.f32.gmra.mxu2 %vm288_vm3, %v3069_v53  ;;  %3827 = vst [vmem:[#allocation39_spill] sm:$0xff] %v3150_v31 }
 0x2e5   :  { %vm572_vm10 = vweird.f32 %v3122_v23 }
 0x2e6   :  { %1090 = vmatpush.msra.mxu3 %v2802_v58  ;;  %v3765_v58 = vunpack.i.l.bf16 %v3082_v49 }
 0x2e7   :  { %v3076_v38 = vpop.f32.mrf.mxu2 }
 0x2e8   :  { %1091 = vmatpush.msra.mxu3 %v2808_v60  ;;  %v3768_v60 = vunpack.i.h.bf16 %v3082_v49 }
 0x2e9   :  { %2306 = vmatmul.msk.f32.gmra.mxu3 %vm288_vm3, %v3818_v35 }
 0x2ea   :  { %1092 = vmatpush.msra.mxu3 %v2814_v62 }
 0x2ef   :  { %v3087_v55 = vpop.f32.mrf.mxu2 }
 0x2f1   :  { %2310 = vmatmul.msk.f32.vlgmr.msrb.gmra.mxu3 %vm223_vm1, %v3085_v21 }
 0x2f2   :  { %2404 = vmatpush.msk.msrb.mxu3 %vm292_vm2, %v3089_v57 }
 0x2f4   :  { %2405 = vmatpush.msrb.mxu3 %v3765_v58 }
 0x2f6   :  { %2406 = vmatpush.msrb.mxu3 %v3768_v60  ;;  %v3110_v60 = vadd.f32 %v485_v33, %v459_v6  ;;  %v3124_v6 = vld [vmem:[#allocation2 + $0x640] sm:$0xff]  ;;  %v3127_v33 = vadd.f32 %v3035_v37, %v462_v16  ;;  %v3144_v37 = vld [vmem:[#allocation2 + $0x610] sm:$0xff] }
 0x2f7   :  { %v3104_v62 = vpop.f32.mrf.mxu2  ;;  %3823 = vst [vmem:[#allocation35_spill] sm:$0xff] %v3124_v6 }
 0x2f8   :  { %2463 = vrcp.f32 %v3110_v60  ;;  %3826 = vst [vmem:[#allocation38_spill] sm:$0xff] %v3144_v37  ;;  %vm557_vm5 = vweird.f32 %v3110_v60  ;;  %vm587_vm12 = vweird.f32 %v3127_v33 }
 0x2f9   :  { %2311 = vmatmul.msk.f32.gmra.mxu3 %vm223_vm1, %v3102_v29  ;;  %2465 = vrcp.f32 %v3122_v23 }
 0x2fa   :  { %2467 = vrcp.f32 %v3127_v33 }
 0x2ff   :  { %v3108_v10 = vpop.f32.mrf.mxu2 }
 0x307   :  { %v742_v54 = vpop.f32.mrf.mxu2 }
 0x30f   :  { %v745_v30 = vpop.f32.mrf.mxu2 }
 0x317   :  { %v748_v46 = vpop.f32.mrf.mxu2 }
 0x31f   :  { %v751_v48 = vpop.f32.mrf.mxu2 }
 0x327   :  { %v754_v53 = vpop.f32.mrf.mxu2 }
 0x328   :  { %v792_v16 = vmul.f32 %v754_v53, %v3130_v17  ;;  %v790_v53 = vmul.f32 %v748_v46, %v3144_v37 }
 0x32f   :  { %v757_v43 = vpop.f32.mrf.mxu2 }
 0x337   :  { %v760_v58 = vpop.f32.mrf.mxu2 }
 0x338   :  { %v794_v19 = vmul.f32 %v760_v58, %v3118_v63  ;;  %v465_v58 = vpop.f32.mrf.mxu1  ;;  %v3158_v63 = vld [vmem:[#allocation2 + $0x5f0] sm:$0xff] }
 0x339   :  { %3828 = vst [vmem:[#allocation40_spill] sm:$0xff] %v3158_v63  ;;  %v788_v46 = vmul.f32 %v742_v54, %v3158_v63 }
 0x33f   :  { %v763_v20 = vpop.f32.mrf.mxu2 }
 0x340   :  { %v795_v14 = vmul.f32 %v763_v20, %v3114_v4  ;;  %v3136_v20 = vld [vmem:[#allocation2 + $0x620] sm:$0xff] }
 0x341   :  { %3825 = vst [vmem:[#allocation37_spill] sm:$0xff] %v3136_v20 }
 0x347   :  { %v766_v18 = vpop.f32.mrf.mxu2 }
 0x348   :  { %v796_v1 = vmul.f32 %v766_v18, %v3112_v41  ;;  %v3132_v18 = vpop.eup %2463  ;;  %v793_v41 = vmul.f32 %v757_v43, %v3124_v6  ;;  %v791_v43 = vmul.f32 %v751_v48, %v3136_v20  ;;  %v3153_v6 = vadd.f32 %v3043_v45, %v465_v58 }
 0x349   :  { %v789_v48 = vmul.f32 %v745_v30, %v3150_v31  ;;  %vm558_vm4 = vweird.f32 %v3132_v18 }
 0x34a   :  { %810 = vmatpush.msrb.mxu0 %v796_v1  ;;  %v540_v1 = vpop.f32.mrf.mxu0  ;;  %vm3207_vm6 = vmor %vm557_vm5, %vm558_vm4 }
 0x34c   :  { %811 = vmatpush.msrb.mxu0 %v795_v14  ;;  %v553_v14 = vmul.f32 %v3132_v18, %v3110_v60 }
 0x34e   :  { %812 = vmatpush.msrb.mxu0 %v794_v19  ;;  %v3148_v19 = vadd.f32 %v540_v1, %v3029_v34  ;;  %v554_v17 = vsub.f32 1.0, %v553_v14  ;;  %v3164_v34 = vld [vmem:[#allocation2 + $0x5e0] sm:$0xff] }
 0x34f   :  { %v3138_v28 = vpop.f32.mrf.mxu2  ;;  %3829 = vst [vmem:[#allocation41_spill] sm:$0xff] %v3164_v34  ;;  %v787_v58 = vmul.f32 %v3108_v10, %v3164_v34  ;;  %v3223_v34 = vld [vmem:[#allocation2 + $0x580] sm:$0xff] }
 0x350   :  { %813 = vmatpush.msrb.mxu0 %v793_v41  ;;  %v3156_v41 = vpop.eup %2465  ;;  %2469 = vrcp.f32 %v3148_v19  ;;  %3836 = vst [vmem:[#allocation46_spill] sm:$0xff] %v3223_v34  ;;  %vm602_vm4 = vweird.f32 %v3148_v19 }
 0x351   :  { %v3160_v4 = vpop.eup %2467  ;;  %v568_v45 = vmul.f32 %v3156_v41, %v3122_v23  ;;  %2471 = vrcp.f32 %v3153_v6  ;;  %vm573_vm8 = vweird.f32 %v3156_v41 }
 0x352   :  { %814 = vmatpush.msrb.mxu0 %v792_v16  ;;  %v555_v16 = vmul.f32 %v3132_v18, %v554_v17  ;;  %v543_v14 = vpop.f32.mrf.mxu0  ;;  %v583_v30 = vmul.f32 %v3160_v4, %v3127_v33  ;;  %vm588_vm9 = vweird.f32 %v3160_v4  ;;  %vm3245_vm11 = vmor %vm572_vm10, %vm573_vm8 }
 0x353   :  { %v569_v31 = vsub.f32 1.0, %v568_v45  ;;  %v3182_v37 = vadd.f32 %v543_v14, %v3037_v40  ;;  %v563_v40 = vand.u32 2147483648, %v3110_v60  ;;  %v3197_v14 = vld [vmem:[#allocation2 + $0x5a0] sm:$0xff]  ;;  %vm3257_vm13 = vmor %vm587_vm12, %vm588_vm9 }
 0x354   :  { %815 = vmatpush.msrb.mxu0 %v791_v43  ;;  %v3173_v43 = vld [vmem:[#allocation2 + $0x5d0] sm:$0xff]  ;;  %v556_v63 = vadd.f32 %v3132_v18, %v555_v16  ;;  %v584_v10 = vsub.f32 1.0, %v583_v30 }
 0x355   :  { %3830 = vst [vmem:[#allocation42_spill] sm:$0xff] %v3173_v43  ;;  %v786_v54 = vmul.f32 %v3104_v62, %v3173_v43  ;;  %v570_v16 = vmul.f32 %v3156_v41, %v569_v31  ;;  %2473 = vrcp.f32 %v3182_v37  ;;  %v122_v43 = vld [vmem:[#allocation2 + $0x6c0] sm:$0xff] }
 0x356   :  { %816 = vmatpush.msrb.mxu0 %v790_v53  ;;  %v3179_v53 = vld [vmem:[#allocation2 + $0x5c0] sm:$0xff]  ;;  %v3186_v17 = vpop.eup %2469  ;;  %v585_v31 = vmul.f32 %v3160_v4, %v584_v10  ;;  %v546_v20 = vmul.f32 %v2913_v32, %v122_v43 }
 0x357   :  { %v3166_v1 = vpop.f32.mrf.mxu2  ;;  %3831 = vst [vmem:[#allocation43_spill] sm:$0xff] %v3179_v53  ;;  %v785_v45 = vmul.f32 %v3087_v55, %v3179_v53  ;;  %v3213_v53 = vld [vmem:[#allocation2 + $0x590] sm:$0xff]  ;;  %v571_v15 = vadd.f32 %v3156_v41, %v570_v16  ;;  %vm603_vm5 = vweird.f32 %v3186_v17 }
 0x358   :  { %817 = vmatpush.msrb.mxu0 %v789_v48  ;;  %v3188_v48 = vld [vmem:[#allocation2 + $0x5b0] sm:$0xff]  ;;  %3835 = vst [vmem:[#allocation45_spill] sm:$0xff] %v3213_v53  ;;  %vm3294_vm8 = vmor %vm602_vm4, %vm603_vm5 }
 0x359   :  { %3832 = vst [vmem:[#allocation44_spill] sm:$0xff] %v3188_v48  ;;  %v784_v30 = vmul.f32 %v3076_v38, %v3188_v48  ;;  %v564_v48 = vor.u32 1.1754944e-38, %v563_v40  ;;  %v586_v40 = vadd.f32 %v3160_v4, %v585_v31 }
 0x35a   :  { %818 = vmatpush.msrb.mxu0 %v788_v46  ;;  %v3192_v46 = vpop.eup %2471 }
 0x35b   :  { %v613_v38 = vmul.f32 %v3192_v46, %v3153_v6  ;;  %v3236_v43 = vpop.eup %2473 }
 0x35c   :  { %819 = vmatpush.msrb.mxu0 %v787_v58  ;;  %v561_v58 = vand.u32 2147483647, %v3110_v60  ;;  %v560_v60 = vsel %vm3207_vm6, %v3132_v18, %v556_v63  ;;  %v782_v63 = vmul.f32 %v3055_v12, %v3213_v53  ;;  %v781_v12 = vmul.f32 %v3049_v51, %v3223_v34  ;;  %v123_v51 = vld [vmem:[#allocation2 + $0x6c8] sm:$0xff] }
 0x35d   :  { %v614_v32 = vsub.f32 1.0, %v613_v38  ;;  %v591_v38 = vand.u32 2147483647, %v3127_v33  ;;  %vm618_vm6 = vweird.f32 %v3192_v46  ;;  %vm633_vm12 = vweird.f32 %v3236_v43 }
 0x35e   :  { %820 = vmatpush.msrb.mxu0 %v786_v54  ;;  %v598_v54 = vmul.f32 %v3186_v17, %v3148_v19  ;;  %vm562_vm7 = vcmp.eq.f32.partialorder %v561_v58, 8.507059e+37  ;;  %v578_v58 = vand.u32 2147483648, %v3122_v23 }
 0x35f   :  { %v775_v62 = vpop.f32.mrf.mxu2  ;;  %v565_v10 = vsel %vm562_vm7, %v564_v48, %v560_v60  ;;  %v593_v48 = vand.u32 2147483648, %v3127_v33  ;;  %v590_v33 = vsel %vm3257_vm13, %v3160_v4, %v586_v40  ;;  %vm592_vm15 = vcmp.eq.f32.partialorder %v591_v38, 8.507059e+37  ;;  %v3374_v38 = vld [vmem:[#allocation2 + $0x3b8] sm:$0xff] }
 0x360   :  { %821 = vmatpush.msrb.mxu0 %v785_v45  ;;  %v783_v45 = vmul.f32 %v3065_v8, %v3197_v14  ;;  %v599_v55 = vsub.f32 1.0, %v598_v54  ;;  %v3232_v8 = vld [vmem:[#allocation2 + $0x6b0] sm:$0xff]  ;;  %v3250_v54 = vld [vmem:[#allocation2 + $0x6a0] sm:$0xff]  ;;  %v566_v31 = vmul.f32 %v565_v10, %v546_v20  ;;  %v628_v20 = vmul.f32 %v3236_v43, %v3182_v37 }
 0x361   :  { %3837 = vst [vmem:[#allocation47_spill] sm:$0xff] %v3232_v8  ;;  %v3266_v10 = vld [vmem:[#allocation2 + $0x690] sm:$0xff]  ;;  %v799_v53 = vmul.f32 %v775_v62, %v3250_v54  ;;  %v594_v16 = vor.u32 1.1754944e-38, %v593_v48  ;;  %vm617_vm7 = vweird.f32 %v3153_v6  ;;  %vm632_vm13 = vweird.f32 %v3182_v37 }
 0x362   :  { %822 = vmatpush.msrb.mxu0 %v784_v30  ;;  %v576_v30 = vand.u32 2147483647, %v3122_v23  ;;  %v575_v23 = vsel %vm3245_vm11, %v3156_v41, %v571_v15  ;;  %v547_v15 = vmul.f32 %v2917_v36, %v123_v51  ;;  %v3275_v41 = vld [vmem:[#allocation2 + $0x680] sm:$0xff]  ;;  %v798_v4 = vmul.f32 %v3166_v1, %v3266_v10  ;;  %vm3298_vm9 = vmor %vm617_vm7, %vm618_vm6 }
 0x363   :  { %v629_v62 = vsub.f32 1.0, %v628_v20  ;;  %v606_v1 = vand.u32 2147483647, %v3148_v19 }
 0x364   :  { %823 = vmatpush.msrb.mxu0 %v783_v45  ;;  %v3230_v18 = vpop.f32.mrf.mxu3  ;;  %vm577_vm14 = vcmp.eq.f32.partialorder %v576_v30, 8.507059e+37  ;;  %v621_v30 = vand.u32 2147483647, %v3153_v6 }
 0x365   :  { %vm607_vm11 = vcmp.eq.f32.partialorder %v606_v1, 8.507059e+37 }
 0x366   :  { %824 = vmatpush.msrb.mxu0 %v782_v63  ;;  %v124_v63 = vld [vmem:[#allocation2 + $0x6d0] sm:$0xff]  ;;  %vm622_vm10 = vcmp.eq.f32.partialorder %v621_v30, 8.507059e+37  ;;  %v3360_v30 = vld [vmem:[#allocation2 + $0x3f8] sm:$0xff] }
 0x367   :  { %v778_v60 = vpop.f32.mrf.mxu2 }
 0x368   :  { %v800_v45 = vmul.f32 %v778_v60, %v3232_v8  ;;  %825 = vmatpush.msrb.mxu0 %v781_v12  ;;  %v615_v12 = vmul.f32 %v3192_v46, %v614_v32  ;;  %v600_v60 = vmul.f32 %v3186_v17, %v599_v55  ;;  %v579_v8 = vor.u32 1.1754944e-38, %v578_v58 }
 0x369   :  { %826 = vmatmul.f32.vlgmr.msrb.gmra.mxu0 %v566_v31  ;;  %v548_v31 = vmul.f32 %v2923_v42, %v124_v63  ;;  %v595_v55 = vsel %vm592_vm15, %v594_v16, %v590_v33  ;;  %v797_v42 = vmul.f32 %v3138_v28, %v3275_v41  ;;  %v623_v58 = vand.u32 2147483648, %v3153_v6  ;;  %v126_v63 = vld [vmem:[#allocation2 + $0x6e0] sm:$0xf]  ;;  %v3848_v28 = vld [vmem:[#allocation8_spill] sm:$0xff] }
 0x36a   :  { %848 = vmatpush.msra.mxu1 %v800_v45  ;;  %v580_v40 = vsel %vm577_vm14, %v579_v8, %v575_v23  ;;  %v616_v36 = vadd.f32 %v3192_v46, %v615_v12  ;;  %v601_v32 = vadd.f32 %v3186_v17, %v600_v60  ;;  %v125_v45 = vld [vmem:[#allocation2 + $0x6d8] sm:$0xff]  ;;  %vm634_vm14 = vmor %vm632_vm13, %vm633_vm12 }
 0x36b   :  { %v596_v8 = vmul.f32 %v595_v55, %v548_v31  ;;  %v581_v48 = vmul.f32 %v580_v40, %v547_v15  ;;  %v624_v23 = vor.u32 1.1754944e-38, %v623_v58 }
 0x36c   :  { %849 = vmatpush.msra.mxu1 %v799_v53  ;;  %v958_v34 = vpop.f32.mrf.mxu3  ;;  %v608_v53 = vand.u32 2147483648, %v3148_v19  ;;  %v620_v51 = vsel %vm3298_vm9, %v3192_v46, %v616_v36  ;;  %v605_v6 = vsel %vm3294_vm8, %v3186_v17, %v601_v32  ;;  %v630_v19 = vmul.f32 %v3236_v43, %v629_v62 }
 0x36d   :  { %v625_v12 = vsel %vm622_vm10, %v624_v23, %v620_v51  ;;  %v549_v46 = vmul.f32 %v2931_v52, %v125_v45  ;;  %v550_v17 = vmul.f32 %v2938_v56, %v126_v63  ;;  %v636_v52 = vand.u32 2147483647, %v3182_v37 }
 0x36e   :  { %850 = vmatpush.msra.mxu1 %v798_v4  ;;  %v609_v20 = vor.u32 1.1754944e-38, %v608_v53  ;;  %v631_v15 = vadd.f32 %v3236_v43, %v630_v19 }
 0x36f   :  { %vm637_vm15 = vcmp.eq.f32.partialorder %v636_v52, 8.507059e+37  ;;  %v3860_v52 = vld [vmem:[#allocation23_spill] sm:$0xff] }
 0x370   :  { %851 = vmatpush.msra.mxu1 %v797_v42  ;;  %v610_v60 = vsel %vm607_vm11, %v609_v20, %v605_v6  ;;  %v635_v56 = vsel %vm634_vm14, %v3236_v43, %v631_v15  ;;  %v3856_v15 = vld [vmem:[#allocation21_spill] sm:$0xff] }
 0x371   :  { %829 = vmatmul.f32.gmra.mxu0 %v596_v8  ;;  %2295 = vmatmul.msk.f32.vlgmr.msra.gmra.mxu1 %vm144_vm0, %v581_v48  ;;  %v611_v31 = vmul.f32 %v610_v60, %v549_v46  ;;  %v3852_v46 = vld [vmem:[#allocation19_spill] sm:$0xff]  ;;  %v3853_v60 = vld [vmem:[#allocation12_spill] sm:$0xff] }
 0x372   :  { %915 = vmatpush.msrb.mxu1 %v2748_v22  ;;  %v638_v22 = vand.u32 2147483648, %v3182_v37 }
 0x374   :  { %1135 = vmatpush.msra.mxu1 %v2898_v24  ;;  %v1007_v33 = vpop.f32.mrf.mxu3  ;;  %v626_v24 = vmul.f32 %v625_v12, %v550_v17  ;;  %v639_v4 = vor.u32 1.1754944e-38, %v638_v22  ;;  %v3855_v17 = vld [vmem:[#allocation13_spill] sm:$0xff]  ;;  %v3857_v22 = vld [vmem:[#allocation14_spill] sm:$0xff] }
 0x375   :  { %v1008_v16 = vadd.f32 %v1007_v33, %v3230_v18  ;;  %v127_v18 = vld [vmem:[#allocation2 + $0x6e8] sm:$0xf] }
 0x376   :  { %1136 = vmatpush.msra.mxu1 %v2903_v25  ;;  %v640_v55 = vsel %vm637_vm15, %v639_v4, %v635_v56  ;;  %v551_v36 = vmul.f32 %v2945_v59, %v127_v18  ;;  %v3861_v56 = vld [vmem:[#allocation16_spill] sm:$0xff]  ;;  %v3863_v4 = vld [vmem:[#allocation17_spill] sm:$0xff] }
 0x377   :  { %2475 = vtanh.f32 %v1008_v16  ;;  %v3854_v16 = vld [vmem:[#allocation20_spill] sm:$0xff] }
 0x378   :  { %1137 = vmatpush.msra.mxu1 %v2907_v26  ;;  %v641_v26 = vmul.f32 %v640_v55, %v551_v36  ;;  %v3862_v18 = vld [vmem:[#allocation24_spill] sm:$0xff]  ;;  %v3865_v55 = vld [vmem:[#allocation18_spill] sm:$0xff] }
 0x379   :  { %832 = vmatmul.f32.gmra.mxu0 %v626_v24  ;;  %2296 = vmatmul.msk.f32.gmra.mxu1 %vm144_vm0, %v611_v31  ;;  %v3858_v24 = vld [vmem:[#allocation22_spill] sm:$0xff]  ;;  %v3859_v31 = vld [vmem:[#allocation15_spill] sm:$0xff]  ;;  %v3868_v36 = vld [vmem:[#allocation28_spill] sm:$0xff] }
 0x37a   :  { %1138 = vmatpush.msra.mxu1 %v2910_v27  ;;  %v3846_v27 = vunpack.i.l.bf16 %v3082_v49 }
 0x37c   :  { %v1010_v25 = vpop.f32.mrf.mxu3 }
 0x37d   :  { %v2476_v40 = vpop.eup %2475  ;;  %v1011_v62 = vadd.f32 %v1010_v25, %v958_v34  ;;  %v3847_v34 = vunpack.i.h.bf16 %v3082_v49  ;;  %v3864_v25 = vld [vmem:[#allocation25_spill] sm:$0xff] }
 0x37e   :  { %v1040_v37 = vmul.f32 1.442695, %v2476_v40  ;;  %v3866_v40 = vld [vmem:[#allocation26_spill] sm:$0xff] }
 0x37f   :  { %2477 = vtanh.f32 %v1011_v62  ;;  %v3867_v62 = vld [vmem:[#allocation27_spill] sm:$0xff] }
 0x380   :  { %2479 = vpow2.f32 %v1040_v37  ;;  %v3869_v37 = vld [vmem:[#allocation29_spill] sm:$0xff] }
 0x381   :  { %2297 = vmatmul.msk.f32.gmra.mxu1 %vm144_vm0, %v641_v26  ;;  %v3870_v26 = vld [vmem:[#allocation30_spill] sm:$0xff] }
 0x385   :  { %v2478_v32 = vpop.eup %2477 }
 0x386   :  { %v3327_v42 = vpop.eup %2479  ;;  %v1044_v43 = vmul.f32 1.442695, %v2478_v32  ;;  %v3871_v32 = vld [vmem:[#allocation31_spill] sm:$0xff] }
 0x387   :  { %1070 = vmatmul.f32.vlgmr.msra.gmra.mxu2 %v3327_v42 }
 0x388   :  { %2481 = vpow2.f32 %v1044_v43 }
 0x389   :  { %2301 = vmatmul.msk.f32.vlgmr.msrb.gmra.mxu1 %vm223_vm1, %v2952_v61 }
 0x38a   :  { %2318 = vmatpush.msk.msrb.mxu1 %vm292_vm2, %v3089_v57 }
 0x38c   :  { %1234 = vmatpush.msrb.mxu1 %v3846_v27 }
 0x38e   :  { %v3336_v59 = vpop.eup %2481  ;;  %1235 = vmatpush.msrb.mxu1 %v3847_v34 }
 0x38f   :  { %1073 = vmatmul.f32.gmra.mxu2 %v3336_v59 }
 0x391   :  { %2302 = vmatmul.msk.f32.gmra.mxu1 %vm223_vm1, %v2964_v0 }
 0x399   :  { %2303 = vmatmul.msk.f32.gmra.mxu1 %vm223_vm1, %v2975_v2  ;;  %v3357_v2 = vld [vmem:[#allocation2 + $0x2c8] sm:$0xff] }
 0x3ee   :  { %v3345_v61 = vpop.f32.mrf.mxu1 }
 0x3f6   :  { %v3347_v58 = vpop.f32.mrf.mxu1 }
 0x3fe   :  { %v3349_v57 = vpop.f32.mrf.mxu1 }
 0x406   :  { %v917_v1 = vpop.f32.mrf.mxu1 }
 0x407   :  { %v927_v0 = vmul.f32 %v917_v1, %v2785_v50  ;;  %v3369_v50 = vld [vmem:[#allocation2 + $0x3c8] sm:$0xff] }
 0x40e   :  { %v920_v53 = vpop.f32.mrf.mxu1 }
 0x40f   :  { %v929_v48 = vmul.f32 %v920_v53, %v2777_v44  ;;  %v3366_v44 = vld [vmem:[#allocation2 + $0x3d8] sm:$0xff] }
 0x416   :  { %v923_v8 = vpop.f32.mrf.mxu1 }
 0x417   :  { %v931_v49 = vmul.f32 %v923_v8, %v2773_v39  ;;  %v3363_v39 = vld [vmem:[#allocation2 + $0x3e8] sm:$0xff] }
 0x419   :  { %2307 = vmatpush.msk.msra.mxu0 %vm292_vm2, %v931_v49 }
 0x41b   :  { %975 = vmatpush.msra.mxu0 %v929_v48 }
 0x41d   :  { %976 = vmatpush.msra.mxu0 %v927_v0 }
 0x41e   :  { %2308 = vmatmul.msk.f32.vlgmr.msra.gmra.mxu0 %vm288_vm3, %v3818_v35 }
 0x41f   :  { %1028 = vmatpush.msrb.mxu0 %v3357_v2 }
 0x421   :  { %1100 = vmatpush.msra.mxu0 %v3360_v30 }
 0x423   :  { %1101 = vmatpush.msra.mxu0 %v3363_v39 }
 0x425   :  { %1102 = vmatpush.msra.mxu0 %v3366_v44 }
 0x426   :  { %2309 = vmatmul.msk.f32.gmra.mxu0 %vm288_vm3, %v3818_v35 }
 0x427   :  { %1103 = vmatpush.msra.mxu0 %v3369_v50 }
 0x429   :  { %1104 = vmatpush.msra.mxu0 %v3374_v38 }
 0x42b   :  { %1105 = vmatpush.msra.mxu0 %v2781_v47  ;;  %v3849_v47 = vld [vmem:[#allocation9_spill] sm:$0xff] }
 0x42d   :  { %1106 = vmatpush.msra.mxu0 %v2842_v3  ;;  %v3850_v3 = vld [vmem:[#allocation10_spill] sm:$0xff] }
 0x42e   :  { %2312 = vmatmul.msk.f32.vlgmr.msrb.gmra.mxu0 %vm223_vm1, %v3085_v21 }
 0x42f   :  { %1107 = vmatpush.msra.mxu0 %v2848_v5  ;;  %v3851_v5 = vld [vmem:[#allocation11_spill] sm:$0xff] }
 0x431   :  { %1108 = vmatpush.msra.mxu0 %v2854_v7  ;;  %v3394_v7 = vpop.f32.mrf.mxu0 }
 0x433   :  { %1109 = vmatpush.msra.mxu0 %v2860_v9 }
 0x435   :  { %1110 = vmatpush.msra.mxu0 %v2866_v11 }
 0x436   :  { %2313 = vmatmul.msk.f32.gmra.mxu0 %vm223_vm1, %v3102_v29 }
 0x437   :  { %1111 = vmatpush.msra.mxu0 %v2872_v13 }
 0x439   :  { %1112 = vmatpush.msra.mxu0 %v3848_v28  ;;  %v3396_v9 = vpop.f32.mrf.mxu0 }
 0x43b   :  { %1113 = vmatpush.msra.mxu0 %v3849_v47 }
 0x43d   :  { %1114 = vmatpush.msra.mxu0 %v3850_v3 }
 0x43f   :  { %1115 = vmatpush.msra.mxu0 %v3851_v5 }
 0x440   :  { %1116 = vmatmul.f32.vlgmr.msra.gmra.mxu0 %v3327_v42 }
 0x441   :  { %v3398_v11 = vpop.f32.mrf.mxu0 }
 0x448   :  { %1119 = vmatmul.f32.gmra.mxu0 %v3336_v59 }
 0x49b   :  { %v978_v13 = vpop.f32.mrf.mxu0 }
 0x4a3   :  { %v981_v21 = vpop.f32.mrf.mxu0 }
 0x4ab   :  { %v1030_v29 = vpop.f32.mrf.mxu0 }
 0x4ac   :  { %v1031_v51 = vadd.f32 %v1030_v29, %v978_v13 }
 0x4ae   :  { %2483 = vtanh.f32 %v1031_v51  ;;  %v1071_v51 = vpop.f32.mrf.mxu2 }
 0x4b3   :  { %v1033_v45 = vpop.f32.mrf.mxu0 }
 0x4b4   :  { %v2484_v6 = vpop.eup %2483  ;;  %v1034_v19 = vadd.f32 %v1033_v45, %v981_v21 }
 0x4b5   :  { %v1042_v63 = vmul.f32 1.442695, %v2484_v6 }
 0x4b6   :  { %2485 = vtanh.f32 %v1034_v19 }
 0x4b7   :  { %2487 = vpow2.f32 %v1042_v63 }
 0x4bc   :  { %v2486_v23 = vpop.eup %2485 }
 0x4bd   :  { %v3400_v20 = vpop.eup %2487  ;;  %v1046_v33 = vmul.f32 1.442695, %v2486_v23  ;;  %v1117_v6 = vpop.f32.mrf.mxu0  ;;  %v3872_v23 = vld [vmem:[#allocation32_spill] sm:$0xff] }
 0x4be   :  { %2314 = vmatmul.msk.f32.vlgmr.msra.gmra.mxu3 %vm144_vm0, %v3400_v20  ;;  %2316 = vmatmul.msk.f32.vlgmr.msra.gmra.mxu1 %vm144_vm0, %v3400_v20 }
 0x4bf   :  { %2489 = vpow2.f32 %v1046_v33 }
 0x4c5   :  { %v3406_v12 = vpop.eup %2489 }
 0x4c6   :  { %2315 = vmatmul.msk.f32.gmra.mxu3 %vm144_vm0, %v3406_v12  ;;  %2317 = vmatmul.msk.f32.gmra.mxu1 %vm144_vm0, %v3406_v12 }
 0x4ce   :  { %2326 = vmatmul.msk.f32.vlgmr.msrb.gmra.mxu3 %vm288_vm3, %v3852_v46  ;;  %2319 = vmatmul.msk.f32.vlgmr.msrb.gmra.mxu1 %vm288_vm3, %v3853_v60  ;;  %v3873_v46 = vld [vmem:[#allocation33_spill] sm:$0xff] }
 0x4d6   :  { %2327 = vmatmul.msk.f32.gmra.mxu3 %vm288_vm3, %v3854_v16  ;;  %2320 = vmatmul.msk.f32.gmra.mxu1 %vm288_vm3, %v3855_v17  ;;  %v1074_v16 = vpop.f32.mrf.mxu2 }
 0x4de   :  { %2328 = vmatmul.msk.f32.gmra.mxu3 %vm288_vm3, %v3856_v15  ;;  %2321 = vmatmul.msk.f32.gmra.mxu1 %vm288_vm3, %v3857_v22  ;;  %v1120_v22 = vpop.f32.mrf.mxu0 }
 0x4e6   :  { %2329 = vmatmul.msk.f32.gmra.mxu3 %vm288_vm3, %v3858_v24  ;;  %2322 = vmatmul.msk.f32.gmra.mxu1 %vm288_vm3, %v3859_v31  ;;  %v3874_v31 = vld [vmem:[#allocation34_spill] sm:$0xff] }
 0x4ee   :  { %2330 = vmatmul.msk.f32.gmra.mxu3 %vm288_vm3, %v3860_v52  ;;  %2323 = vmatmul.msk.f32.gmra.mxu1 %vm288_vm3, %v3861_v56 }
 0x4f6   :  { %2331 = vmatmul.msk.f32.gmra.mxu3 %vm288_vm3, %v3862_v18  ;;  %2324 = vmatmul.msk.f32.gmra.mxu1 %vm288_vm3, %v3863_v4  ;;  %v3875_v4 = vld [vmem:[#allocation35_spill] sm:$0xff] }
 0x4fe   :  { %2332 = vmatmul.msk.f32.gmra.mxu3 %vm288_vm3, %v3864_v25  ;;  %2325 = vmatmul.msk.f32.gmra.mxu1 %vm288_vm3, %v3865_v55 }
 0x506   :  { %2333 = vmatmul.msk.f32.gmra.mxu3 %vm288_vm3, %v3866_v40  ;;  %v3876_v40 = vld [vmem:[#allocation36_spill] sm:$0xff] }
 0x50e   :  { %2334 = vmatmul.msk.f32.gmra.mxu3 %vm288_vm3, %v3867_v62 }
 0x516   :  { %2335 = vmatmul.msk.f32.gmra.mxu3 %vm288_vm3, %v3868_v36 }
 0x51e   :  { %2336 = vmatmul.msk.f32.gmra.mxu3 %vm288_vm3, %v3869_v37  ;;  %v3877_v37 = vld [vmem:[#allocation37_spill] sm:$0xff] }
 0x526   :  { %2337 = vmatmul.msk.f32.gmra.mxu3 %vm288_vm3, %v3870_v26 }
 0x52e   :  { %2338 = vmatmul.msk.f32.gmra.mxu3 %vm288_vm3, %v3871_v32  ;;  %v3878_v32 = vld [vmem:[#allocation38_spill] sm:$0xff] }
 0x53b   :  { %v1140_v34 = vpop.f32.mrf.mxu1 }
 0x53c   :  { %v3463_v17 = vadd.f32 %v1140_v34, %v1117_v6  ;;  %v3880_v6 = vld [vmem:[#allocation40_spill] sm:$0xff] }
 0x53e   :  { %vm1170_vm8 = vweird.f32 %v3463_v17 }
 0x541   :  { %v1094_v43 = vpop.f32.mrf.mxu3 }
 0x542   :  { %v3458_v19 = vadd.f32 %v1094_v43, %v1071_v51 }
 0x543   :  { %v1143_v8 = vpop.f32.mrf.mxu1 }
 0x544   :  { %2491 = vrcp.f32 %v3458_v19  ;;  %v3468_v56 = vadd.f32 %v1143_v8, %v1120_v22  ;;  %v3883_v22 = vld [vmem:[#allocation43_spill] sm:$0xff]  ;;  %vm1155_vm5 = vweird.f32 %v3458_v19 }
 0x545   :  { %2493 = vrcp.f32 %v3463_v17 }
 0x546   :  { %vm1200_vm14 = vweird.f32 %v3468_v56 }
 0x549   :  { %v1097_v27 = vpop.f32.mrf.mxu3 }
 0x54a   :  { %v3465_v24 = vadd.f32 %v1097_v27, %v1074_v16  ;;  %v3470_v18 = vpop.eup %2491 }
 0x54b   :  { %v3452_v48 = vpop.f32.mrf.mxu1  ;;  %v1151_v36 = vmul.f32 %v3470_v18, %v3458_v19  ;;  %v3483_v27 = vpop.eup %2493  ;;  %vm1156_vm4 = vweird.f32 %v3470_v18 }
 0x54c   :  { %2495 = vrcp.f32 %v3465_v24  ;;  %vm3509_vm6 = vmor %vm1155_vm5, %vm1156_vm4  ;;  %vm1171_vm9 = vweird.f32 %v3483_v27  ;;  %vm1185_vm13 = vweird.f32 %v3465_v24 }
 0x54d   :  { %2497 = vrcp.f32 %v3468_v56  ;;  %v1152_v34 = vsub.f32 1.0, %v1151_v36  ;;  %vm3539_vm12 = vmor %vm1170_vm8, %vm1171_vm9 }
 0x551   :  { %v1258_v1 = vpop.f32.mrf.mxu3 }
 0x553   :  { %v3454_v28 = vpop.f32.mrf.mxu1 }
 0x559   :  { %v1261_v53 = vpop.f32.mrf.mxu3 }
 0x55b   :  { %v3456_v3 = vpop.f32.mrf.mxu1 }
 0x561   :  { %v1264_v49 = vpop.f32.mrf.mxu3 }
 0x562   :  { %v1306_v43 = vmul.f32 %v1264_v49, %v3878_v32  ;;  %v1166_v49 = vmul.f32 %v3483_v27, %v3463_v17  ;;  %v3515_v32 = vld [vmem:[#allocation2 + $0x6f0] sm:$0xff] }
 0x563   :  { %v1246_v21 = vpop.f32.mrf.mxu1 }
 0x569   :  { %v1267_v0 = vpop.f32.mrf.mxu3 }
 0x56a   :  { %v1307_v26 = vmul.f32 %v1267_v0, %v3877_v37  ;;  %v3881_v0 = vld [vmem:[#allocation41_spill] sm:$0xff] }
 0x56b   :  { %v1249_v45 = vpop.f32.mrf.mxu1 }
 0x571   :  { %v1270_v47 = vpop.f32.mrf.mxu3 }
 0x572   :  { %v1308_v62 = vmul.f32 %v1270_v47, %v3876_v40 }
 0x573   :  { %v1252_v15 = vpop.f32.mrf.mxu1 }
 0x579   :  { %v1273_v5 = vpop.f32.mrf.mxu3 }
 0x57a   :  { %v1309_v25 = vmul.f32 %v1273_v5, %v3875_v4  ;;  %v3485_v5 = vpop.eup %2495 }
 0x57b   :  { %v1255_v8 = vpop.f32.mrf.mxu1  ;;  %vm1186_vm10 = vweird.f32 %v3485_v5 }
 0x57c   :  { %vm3551_vm15 = vmor %vm1185_vm13, %vm1186_vm10 }
 0x581   :  { %v1276_v13 = vpop.f32.mrf.mxu3 }
 0x582   :  { %v1310_v52 = vmul.f32 %v1276_v13, %v3874_v31  ;;  %v3879_v13 = vld [vmem:[#allocation39_spill] sm:$0xff]  ;;  %v1301_v31 = vmul.f32 %v1249_v45, %v3883_v22 }
 0x583   :  { %v1305_v47 = vmul.f32 %v1261_v53, %v3879_v13  ;;  %v3887_v13 = vld [vmem:[#allocation45_spill] sm:$0xff] }
 0x589   :  { %v1279_v29 = vpop.f32.mrf.mxu3 }
 0x58a   :  { %v1311_v60 = vmul.f32 %v1279_v29, %v3873_v46  ;;  %v3488_v29 = vpop.eup %2497  ;;  %v1181_v46 = vmul.f32 %v3485_v5, %v3465_v24 }
 0x58b   :  { %v1196_v53 = vmul.f32 %v3488_v29, %v3468_v56  ;;  %vm1201_vm11 = vweird.f32 %v3488_v29 }
 0x58c   :  { %v1182_v4 = vsub.f32 1.0, %v1181_v46  ;;  %vm3557_vm4 = vmor %vm1200_vm14, %vm1201_vm11 }
 0x58d   :  { %v1197_v40 = vsub.f32 1.0, %v1196_v53 }
 0x591   :  { %v1282_v63 = vpop.f32.mrf.mxu3 }
 0x592   :  { %v1312_v33 = vmul.f32 %v1282_v63, %v3872_v23  ;;  %v1304_v63 = vmul.f32 %v1258_v1, %v3880_v6  ;;  %v1303_v23 = vmul.f32 %v1255_v8, %v3881_v0  ;;  %v1167_v1 = vsub.f32 1.0, %v1166_v49 }
 0x593   :  { %v1198_v8 = vmul.f32 %v3488_v29, %v1197_v40  ;;  %v1191_v49 = vand.u32 2147483648, %v3465_v24  ;;  %v3571_v40 = vld [vmem:[#allocation2 + $0x700] sm:$0xf] }
 0x594   :  { %1323 = vmatpush.msra.mxu1 %v1312_v33  ;;  %v1153_v33 = vmul.f32 %v3470_v18, %v1152_v34  ;;  %v1183_v34 = vmul.f32 %v3485_v5, %v1182_v4  ;;  %v1148_v45 = vmul.f32 %v3336_v59, %v3571_v40  ;;  %v1371_v59 = vld [vmem:[#allocation2 + $0xc0] sm:$0xff] }
 0x596   :  { %1324 = vmatpush.msra.mxu1 %v1311_v60  ;;  %v3882_v60 = vld [vmem:[#allocation42_spill] sm:$0xff]  ;;  %v1184_v0 = vadd.f32 %v3485_v5, %v1183_v34  ;;  %v1372_v34 = vld [vmem:[#allocation2 + $0xd0] sm:$0xff] }
 0x597   :  { %v1302_v16 = vmul.f32 %v1252_v15, %v3882_v60  ;;  %v1159_v15 = vand.u32 2147483647, %v3458_v19  ;;  %v1189_v60 = vand.u32 2147483647, %v3465_v24 }
 0x598   :  { %1325 = vmatpush.msra.mxu1 %v1310_v52  ;;  %v1154_v52 = vadd.f32 %v3470_v18, %v1153_v33  ;;  %v1188_v24 = vsel %vm3551_vm15, %v3485_v5, %v1184_v0 }
 0x599   :  { %v3474_v55 = vpop.f32.mrf.mxu3  ;;  %vm1160_vm7 = vcmp.eq.f32.partialorder %v1159_v15, 8.507059e+37  ;;  %v3575_v15 = vld [vmem:[#allocation2 + $0x708] sm:$0xf] }
 0x59a   :  { %1326 = vmatpush.msra.mxu1 %v1309_v25  ;;  %v1161_v25 = vand.u32 2147483648, %v3458_v19 }
 0x59c   :  { %1327 = vmatpush.msra.mxu1 %v1308_v62  ;;  %v3884_v62 = vld [vmem:[#allocation44_spill] sm:$0xff]  ;;  %v1162_v19 = vor.u32 1.1754944e-38, %v1161_v25 }
 0x59d   :  { %v1300_v36 = vmul.f32 %v1246_v21, %v3884_v62  ;;  %v1158_v21 = vsel %vm3509_vm6, %v3470_v18, %v1154_v52  ;;  %v1192_v62 = vor.u32 1.1754944e-38, %v1191_v49  ;;  %vm1190_vm6 = vcmp.eq.f32.partialorder %v1189_v60, 8.507059e+37 }
 0x59e   :  { %1328 = vmatpush.msra.mxu1 %v1307_v26  ;;  %v1299_v26 = vmul.f32 %v3456_v3, %v3197_v14  ;;  %v1146_v14 = vmul.f32 %v3327_v42, %v3515_v32  ;;  %v1174_v3 = vand.u32 2147483647, %v3463_v17  ;;  %v1163_v18 = vsel %vm1160_vm7, %v1162_v19, %v1158_v21  ;;  %v3888_v42 = vld [vmem:[#allocation46_spill] sm:$0xff] }
 0x59f   :  { %v1313_v21 = vmul.f32 %v3474_v55, %v3275_v41  ;;  %v1369_v41 = vld [vmem:[#allocation2 + $0xa0] sm:$0xff]  ;;  %v857_v55 = vadd.f32 %v3347_v58, %v3396_v9 }
 0x5a0   :  { %1329 = vmatpush.msra.mxu1 %v1306_v43  ;;  %v1168_v43 = vmul.f32 %v3483_v27, %v1167_v1  ;;  %v1164_v53 = vmul.f32 %v1163_v18, %v1146_v14  ;;  %vm1175_vm5 = vcmp.eq.f32.partialorder %v1174_v3, 8.507059e+37  ;;  %v1452_v14 = vld [vmem:[#allocation2 + $0x140] sm:$0xff]  ;;  %v1488_v1 = vld [vmem:[#allocation2 + $0x190] sm:$0xff] }
 0x5a1   :  { %v3490_v51 = vpop.f32.mrf.mxu3  ;;  %v1415_v58 = vld [vmem:[#allocation2 + $0x120] sm:$0xff] }
 0x5a2   :  { %1330 = vmatpush.msra.mxu1 %v1305_v47  ;;  %v1298_v47 = vmul.f32 %v3454_v28, %v3887_v13  ;;  %v1169_v6 = vadd.f32 %v3483_v27, %v1168_v43  ;;  %v1199_v28 = vadd.f32 %v3488_v29, %v1198_v8  ;;  %v1149_v43 = vmul.f32 %v3406_v12, %v3575_v15  ;;  %v1455_v13 = vld [vmem:[#allocation2 + $0x170] sm:$0xff]  ;;  %v1413_v9 = vld [vmem:[#allocation2 + $0x100] sm:$0xff] }
 0x5a3   :  { %v854_v12 = vadd.f32 %v3345_v61, %v3394_v7  ;;  %v860_v8 = vadd.f32 %v3349_v57, %v3398_v11  ;;  %v3600_v61 = vld [vmem:[#allocation2 + $0x2c0] sm:$0xff]  ;;  %v1414_v7 = vld [vmem:[#allocation2 + $0x110] sm:$0xff] }
 0x5a4   :  { %1331 = vmatpush.msra.mxu1 %v1304_v63  ;;  %v1176_v63 = vand.u32 2147483648, %v3463_v17  ;;  %v1206_v17 = vand.u32 2147483648, %v3468_v56  ;;  %v1203_v4 = vsel %vm3557_vm4, %v3488_v29, %v1199_v28  ;;  %v1193_v29 = vsel %vm1190_vm6, %v1192_v62, %v1188_v24  ;;  %v1412_v57 = vld [vmem:[#allocation2 + $0xf0] sm:$0xff]  ;;  %v1491_v11 = vld [vmem:[#allocation2 + $0x1c0] sm:$0xff] }
 0x5a5   :  { %v1456_v24 = vld [vmem:[#allocation2 + $0x180] ss:$0 sm:$0xff]  ;;  %v1416_v62 = vld [vmem:[#allocation2 + $0x130] ss:$0 sm:$0xff] }
 0x5a6   :  { %1332 = vmatpush.msra.mxu1 %v1303_v23  ;;  %v1297_v23 = vmul.f32 %v3452_v48, %v3888_v42  ;;  %v3891_v48 = vld [vmem:[#allocation47_spill] sm:$0xff]  ;;  %v1177_v52 = vor.u32 1.1754944e-38, %v1176_v63  ;;  %v1207_v5 = vor.u32 1.1754944e-38, %v1206_v17  ;;  %v1373_v63 = vld [vmem:[#allocation2 + $0xe0] ss:$0 sm:$0xff] }
 0x5a8   :  { %1333 = vmatpush.msra.mxu1 %v1302_v16  ;;  %v1204_v16 = vand.u32 2147483647, %v3468_v56  ;;  %v1173_v56 = vsel %vm3539_vm12, %v3483_v27, %v1169_v6  ;;  %v1314_v27 = vmul.f32 %v3490_v51, %v3266_v10  ;;  %v1194_v10 = vmul.f32 %v1193_v29, %v1148_v45 }
 0x5a9   :  { %v1291_v37 = vpop.f32.mrf.mxu3 }
 0x5aa   :  { %1334 = vmatpush.msra.mxu1 %v1301_v31  ;;  %v1315_v25 = vmul.f32 %v1291_v37, %v3250_v54  ;;  %vm1205_vm7 = vcmp.eq.f32.partialorder %v1204_v16, 8.507059e+37  ;;  %v1178_v54 = vsel %vm1175_vm5, %v1177_v52, %v1173_v56  ;;  %v1489_v31 = vld [vmem:[#allocation2 + $0x1a0] sm:$0xff] }
 0x5ab   :  { %v1208_v37 = vsel %vm1205_vm7, %v1207_v5, %v1203_v4 }
 0x5ac   :  { %1335 = vmatpush.msra.mxu1 %v1300_v36  ;;  %v3573_v36 = vld [vmem:[#allocation2 + $0x6f8] sm:$0xff]  ;;  %v1209_v19 = vmul.f32 %v1208_v37, %v1149_v43 }
 0x5ae   :  { %1336 = vmatpush.msra.mxu1 %v1299_v26  ;;  %v1147_v26 = vmul.f32 %v3400_v20, %v3573_v36  ;;  %v1370_v20 = vld [vmem:[#allocation2 + $0xb0] sm:$0xff] }
 0x5b0   :  { %1337 = vmatpush.msra.mxu1 %v1298_v47  ;;  %v1179_v51 = vmul.f32 %v1178_v54, %v1147_v26  ;;  %v1453_v47 = vld [vmem:[#allocation2 + $0x150] sm:$0xff] }
 0x5b1   :  { %v1294_v46 = vpop.f32.mrf.mxu3 }
 0x5b2   :  { %v1316_v22 = vmul.f32 %v1294_v46, %v3891_v48  ;;  %1338 = vmatpush.msra.mxu1 %v1297_v23 }
 0x5b3   :  { %1339 = vmatmul.f32.vlgmr.msra.gmra.mxu1 %v1164_v53 }
 0x5b4   :  { %1358 = vmatpush.msrb.mxu0 %v1316_v22  ;;  %2407 = vmatpush.msrb.mxu2 %v1316_v22  ;;  %v1490_v22 = vld [vmem:[#allocation2 + $0x1b0] sm:$0xff] }
 0x5b5   :  { %1438 = vmatpush.msrb.mxu1 %v1415_v58 }
 0x5b6   :  { %1359 = vmatpush.msrb.mxu0 %v1315_v25  ;;  %2408 = vmatpush.msrb.mxu2 %v1315_v25 }
 0x5b7   :  { %1439 = vmatpush.msrb.mxu1 %v1414_v7 }
 0x5b8   :  { %1360 = vmatpush.msrb.mxu0 %v1314_v27  ;;  %2409 = vmatpush.msrb.mxu2 %v1314_v27 }
 0x5b9   :  { %1440 = vmatpush.msrb.mxu1 %v1413_v9 }
 0x5ba   :  { %1361 = vmatpush.msrb.mxu0 %v1313_v21  ;;  %2410 = vmatpush.msrb.mxu2 %v1313_v21 }
 0x5bb   :  { %1342 = vmatmul.f32.gmra.mxu1 %v1194_v10  ;;  %2339 = vmatmul.msk.f32.vlgmr.msrb.gmra.mxu0 %vm144_vm0, %v1179_v51  ;;  %v2532_v10 = vld [vmem:[#allocation2 + $0x3a8] sm:$0xff]  ;;  %v2533_v51 = vld [vmem:[#allocation2 + $0x398] sm:$0xff] }
 0x5bc   :  { %2340 = vmatmul.msk.f32.vlgmr.msrb.gmra.mxu2 %vm144_vm0, %v1209_v19  ;;  %1395 = vmatpush.msra.mxu0 %v1372_v34  ;;  %v2534_v34 = vld [vmem:[#allocation2 + $0x388] sm:$0xff]  ;;  %v2535_v19 = vld [vmem:[#allocation2 + $0x378] sm:$0xff] }
 0x5bd   :  { %1578 = vmatpush.msra.mxu2 %v3357_v2  ;;  %1441 = vmatpush.msrb.mxu1 %v1412_v57 }
 0x5be   :  { %1396 = vmatpush.msra.mxu0 %v1371_v59  ;;  %v2536_v59 = vld [vmem:[#allocation2 + $0x368] sm:$0xff] }
 0x5bf   :  { %1695 = vmatpush.msrb.mxu2 %v3357_v2  ;;  %v1454_v2 = vld [vmem:[#allocation2 + $0x160] sm:$0xff]  ;;  %1511 = vmatpush.msra.mxu1 %v1491_v11 }
 0x5c0   :  { %1397 = vmatpush.msra.mxu0 %v1370_v20  ;;  %v2537_v20 = vld [vmem:[#allocation2 + $0x358] sm:$0xff] }
 0x5c1   :  { %1512 = vmatpush.msra.mxu1 %v1490_v22 }
 0x5c2   :  { %1398 = vmatpush.msra.mxu0 %v1369_v41 }
 0x5c3   :  { %2341 = vmatmul.msk.f32.vlgmr.msra.gmra.mxu0 %vm144_vm0, %v854_v12  ;;  %1513 = vmatpush.msra.mxu1 %v1489_v31  ;;  %v2541_v12 = vld [vmem:[#allocation2 + $0x318] sm:$0xff] }
 0x5c4   :  { %1475 = vmatpush.msrb.mxu0 %v1455_v13 }
 0x5c5   :  { %1514 = vmatpush.msra.mxu1 %v1488_v1  ;;  %v2551_v1 = vld [vmem:[#allocation2 + $0x2f8] sm:$0xf] }
 0x5c6   :  { %1476 = vmatpush.msrb.mxu0 %v1454_v2 }
 0x5c8   :  { %1477 = vmatpush.msrb.mxu0 %v1453_v47 }
 0x5ca   :  { %1478 = vmatpush.msrb.mxu0 %v1452_v14 }
 0x5cb   :  { %2342 = vmatmul.msk.f32.gmra.mxu0 %vm144_vm0, %v857_v55 }
 0x5cc   :  { %1552 = vmatpush.msra.mxu0 %v3600_v61 }
 0x5d3   :  { %2343 = vmatmul.msk.f32.gmra.mxu0 %vm144_vm0, %v860_v8  ;;  %v2542_v8 = vld [vmem:[#allocation2 + $0x308] sm:$0xff] }
 0x630   :  { %v1340_v3 = vpop.f32.mrf.mxu1 }
 0x638   :  { %v1363_v18 = vpop.f32.mrf.mxu0  ;;  %v1343_v28 = vpop.f32.mrf.mxu1 }
 0x639   :  { %v1364_v6 = vadd.f32 %v1363_v18, %v1340_v3  ;;  %v2543_v3 = vld [vmem:[#allocation2 + $0x4c0] sm:$0xff]  ;;  %v2544_v18 = vld [vmem:[#allocation2 + $0x4d0] sm:$0xff] }
 0x63b   :  { %2347 = vmatmul.msk.f32.vlgmr.msrb.gmra.mxu0 %vm144_vm0, %v1364_v6 }
 0x63f   :  { %v1366_v0 = vpop.f32.mrf.mxu2 }
 0x640   :  { %v1400_v42 = vpop.f32.mrf.mxu0  ;;  %v1367_v23 = vadd.f32 %v1366_v0, %v1343_v28 }
 0x641   :  { %v1401_v49 = vadd.f32 %v1400_v42, %v1373_v63 }
 0x643   :  { %v1409_v33 = vmax.f32 %v1401_v49, 0.0  ;;  %2348 = vmatmul.msk.f32.gmra.mxu0 %vm144_vm0, %v1367_v23  ;;  %v2546_v23 = vld [vmem:[#allocation2 + $0x4f0] sm:$0xff] }
 0x645   :  { %2344 = vmatmul.msk.f32.vlgmr.msrb.gmra.mxu1 %vm144_vm0, %v1409_v33 }
 0x648   :  { %v1403_v17 = vpop.f32.mrf.mxu0 }
 0x649   :  { %v1404_v46 = vadd.f32 %v1403_v17, %v1373_v63  ;;  %v2547_v17 = vld [vmem:[#allocation2 + $0x500] sm:$0xff] }
 0x64b   :  { %v1410_v53 = vmax.f32 %v1404_v46, 0.0  ;;  %v2548_v46 = vld [vmem:[#allocation2 + $0x2f0] sm:$0xf] }
 0x64d   :  { %2345 = vmatmul.msk.f32.gmra.mxu1 %vm144_vm0, %v1410_v53 }
 0x650   :  { %v1406_v60 = vpop.f32.mrf.mxu0 }
 0x651   :  { %v1407_v16 = vadd.f32 %v1406_v60, %v1373_v63  ;;  %v2545_v63 = vld [vmem:[#allocation2 + $0x4e0] sm:$0xff] }
 0x652   :  { %v2549_v60 = vld [vmem:[#allocation2 + $0x2e0] sm:$0xff] }
 0x653   :  { %v1411_v48 = vmax.f32 %v1407_v16, 0.0 }
 0x655   :  { %2346 = vmatmul.msk.f32.gmra.mxu1 %vm144_vm0, %v1411_v48  ;;  %v2550_v48 = vld [vmem:[#allocation2 + $0x2d0] sm:$0xff] }
 0x6b8   :  { %v1480_v56 = vpop.f32.mrf.mxu0 }
 0x6b9   :  { %v1481_v52 = vadd.f32 %v1480_v56, %v1456_v24  ;;  %v2552_v56 = vld [vmem:[#allocation2 + $0x510] sm:$0xff] }
 0x6bb   :  { %v1486_v4 = vmax.f32 %v1481_v52, 0.0  ;;  %v2553_v52 = vld [vmem:[#allocation2 + $0x2e8] sm:$0xff] }
 0x6bd   :  { %2349 = vmatmul.msk.f32.vlgmr.msra.gmra.mxu1 %vm144_vm0, %v1486_v4 }
 0x6c0   :  { %v1483_v25 = vpop.f32.mrf.mxu0 }
 0x6c1   :  { %v1484_v5 = vadd.f32 %v1483_v25, %v1456_v24  ;;  %v2554_v25 = vld [vmem:[#allocation2 + $0x430] sm:$0xff] }
 0x6c2   :  { %v1443_v27 = vpop.f32.mrf.mxu1 }
 0x6c3   :  { %v1487_v29 = vmax.f32 %v1484_v5, 0.0  ;;  %v1444_v54 = vadd.f32 %v1443_v27, %v1416_v62  ;;  %v2556_v27 = vld [vmem:[#allocation2 + $0x420] sm:$0xff] }
 0x6c5   :  { %1525 = vrot.lane.b32.xlu2 %v1444_v54, %s2673_s1  ;;  %2350 = vmatmul.msk.f32.gmra.mxu1 %vm144_vm0, %v1487_v29  ;;  %v2557_v29 = vld [vmem:[#allocation2 + $0x410] sm:$0xff] }
 0x6ca   :  { %v1446_v37 = vpop.f32.mrf.mxu1 }
 0x6cb   :  { %v1447_v45 = vadd.f32 %v1446_v37, %v1416_v62  ;;  %v2559_v37 = vld [vmem:[#allocation2 + $0x520] sm:$0xff] }
 0x6cd   :  { %1527 = vrot.lane.b32.xlu0 %v1447_v45, %s2673_s1  ;;  %v2431_v47 = vpack.i.bf16 %v1444_v54, %v1447_v45 }
 0x6d2   :  { %v1449_v26 = vpop.f32.mrf.mxu1 }
 0x6d3   :  { %v1450_v43 = vadd.f32 %v1449_v26, %v1416_v62  ;;  %v2555_v62 = vld [vmem:[#allocation2 + $0x2d8] sm:$0xff]  ;;  %v2562_v26 = vld [vmem:[#allocation2 + $0x3d0] sm:$0xff] }
 0x6d5   :  { %1529 = vrot.lane.b32.xlu1 %v1450_v43, %s2673_s1 }
 0x6dd   :  { %1881 = vrot.lane.b32.xlu1 %v1450_v43, %s2668_s27 }
 0x71f   :  { %v1526_v21 = vpop.permute.xlu2 %1525 }
 0x720   :  { %2351 = vmatmul.msk.f32.vlgmr.msra.gmra.mxu0 %vm223_vm1, %v1526_v21  ;;  %2354 = vmatmul.msk.f32.vlgmr.msra.gmra.mxu2 %vm223_vm1, %v1526_v21  ;;  %v2564_v21 = vld [vmem:[#allocation2 + $0x3b0] sm:$0xff] }
 0x721   :  { %1767 = vmatpush.msra.mxu2 %v3360_v30  ;;  %v2538_v30 = vld [vmem:[#allocation2 + $0x348] sm:$0xff] }
 0x723   :  { %1768 = vmatpush.msra.mxu2 %v3363_v39  ;;  %v1492_v39 = vld [vmem:[#allocation2 + $0x1d0] ss:$0 sm:$0xff] }
 0x725   :  { %1769 = vmatpush.msra.mxu2 %v3366_v44  ;;  %v2539_v44 = vld [vmem:[#allocation2 + $0x338] sm:$0xff] }
 0x727   :  { %1770 = vmatpush.msra.mxu2 %v3369_v50 }
 0x729   :  { %1771 = vmatpush.msra.mxu2 %v3374_v38  ;;  %v2540_v38 = vld [vmem:[#allocation2 + $0x328] sm:$0xff] }
 0x72b   :  { %1772 = vmatpush.msra.mxu2 %v2532_v10  ;;  %v2565_v10 = vld [vmem:[#allocation2 + $0x530] sm:$0xff] }
 0x72d   :  { %1773 = vmatpush.msra.mxu2 %v2533_v51  ;;  %v2566_v51 = vld [vmem:[#allocation2 + $0x3a0] sm:$0xff] }
 0x72f   :  { %1774 = vmatpush.msra.mxu2 %v2534_v34  ;;  %v2567_v34 = vld [vmem:[#allocation2 + $0x438] sm:$0xff] }
 0x731   :  { %1775 = vmatpush.msra.mxu2 %v2535_v19  ;;  %v2568_v19 = vld [vmem:[#allocation2 + $0x390] sm:$0xff] }
 0x733   :  { %1776 = vmatpush.msra.mxu2 %v2536_v59  ;;  %v2569_v59 = vld [vmem:[#allocation2 + $0x428] sm:$0xff] }
 0x735   :  { %1777 = vmatpush.msra.mxu2 %v2537_v20  ;;  %v2570_v20 = vld [vmem:[#allocation2 + $0x380] sm:$0xff] }
 0x737   :  { %1778 = vmatpush.msra.mxu2 %v2538_v30  ;;  %v2571_v30 = vld [vmem:[#allocation2 + $0x418] sm:$0xff] }
 0x739   :  { %1779 = vmatpush.msra.mxu2 %v2539_v44  ;;  %v2574_v44 = vld [vmem:[#allocation2 + $0x540] sm:$0xff] }
 0x73a   :  { %v1516_v50 = vpop.f32.mrf.mxu1 }
 0x73b   :  { %v3618_v41 = vadd.f32 %v1516_v50, %v1492_v39  ;;  %1780 = vmatpush.msra.mxu2 %v2540_v38  ;;  %v2575_v50 = vld [vmem:[#allocation2 + $0x360] sm:$0xff]  ;;  %v2576_v38 = vld [vmem:[#allocation2 + $0x350] sm:$0xff] }
 0x73d   :  { %1649 = vrot.lane.b32.xlu2 %v3618_v41, %s2668_s27  ;;  %1781 = vmatpush.msra.mxu2 %v2541_v12  ;;  %v2577_v12 = vld [vmem:[#allocation2 + $0x340] sm:$0xff] }
 0x73f   :  { %v1528_v55 = vpop.permute.xlu0 %1527  ;;  %1782 = vmatpush.msra.mxu2 %v2542_v8  ;;  %v2579_v8 = vld [vmem:[#allocation2 + $0x550] sm:$0xff] }
 0x740   :  { %2352 = vmatmul.msk.f32.gmra.mxu0 %vm223_vm1, %v1528_v55  ;;  %2355 = vmatmul.msk.f32.gmra.mxu2 %vm223_vm1, %v1528_v55  ;;  %v2578_v55 = vld [vmem:[#allocation2 + $0x330] sm:$0xff] }
 0x742   :  { %v1519_v13 = vpop.f32.mrf.mxu1 }
 0x743   :  { %v3624_v2 = vadd.f32 %v1519_v13, %v1492_v39  ;;  %v2573_v39 = vld [vmem:[#allocation2 + $0x408] sm:$0xff]  ;;  %v2580_v13 = vld [vmem:[#allocation2 + $0x320] sm:$0xff] }
 0x745   :  { %1651 = vrot.lane.b32.xlu0 %v3624_v2, %s2668_s27  ;;  %2432 = vrot.lane.b32.xlu2 %v2431_v47, %s2668_s27  ;;  %v2581_v47 = vld [vmem:[#allocation2 + $0x310] sm:$0xff] }
 0x747   :  { %v1530_v14 = vpop.permute.xlu1 %1529 }
 0x748   :  { %2353 = vmatmul.msk.f32.gmra.mxu0 %vm223_vm1, %v1530_v14  ;;  %2356 = vmatmul.msk.f32.gmra.mxu2 %vm223_vm1, %v1530_v14  ;;  %v2582_v14 = vld [vmem:[#allocation2 + $0x300] sm:$0xff] }
 0x74f   :  { %v3631_v58 = vpop.permute.xlu1 %1881 }
 0x750   :  { %2411 = vmatpush.msk.msra.mxu3 %vm292_vm2, %v3631_v58 }
 0x797   :  { %v3635_v7 = vpop.permute.xlu2 %1649 }
 0x798   :  { %2365 = vmatmul.msk.f32.vlgmr.msrb.gmra.mxu2 %vm223_vm1, %v3635_v7 }
 0x799   :  { %2394 = vmatpush.msk.msrb.mxu2 %vm292_vm2, %v1450_v43  ;;  %v2563_v43 = vld [vmem:[#allocation2 + $0x3c0] sm:$0xff] }
 0x79b   :  { %2055 = vmatpush.msrb.mxu2 %v1447_v45  ;;  %v2561_v45 = vld [vmem:[#allocation2 + $0x400] sm:$0xff] }
 0x79d   :  { %2056 = vmatpush.msrb.mxu2 %v1444_v54  ;;  %v1554_v6 = vpop.f32.mrf.mxu0  ;;  %v2558_v54 = vld [vmem:[#allocation2 + $0x3f0] sm:$0xff] }
 0x79e   :  { %v1589_v22 = vmul.f32 %v2550_v48, %v1554_v6 }
 0x79f   :  { %v3640_v9 = vpop.permute.xlu2 %2432 }
 0x7a0   :  { %v2434_v57 = vunpack.i.l.bf16 %v3640_v9  ;;  %v2435_v11 = vunpack.i.h.bf16 %v3640_v9 }
 0x7a2   :  { %2412 = vmatpush.msra.mxu3 %v2434_v57 }
 0x7a3   :  { %v1580_v28 = vpop.f32.mrf.mxu2 }
 0x7a4   :  { %2413 = vmatpush.msra.mxu3 %v2435_v11  ;;  %v1590_v5 = vmul.f32 %v2555_v62, %v1580_v28 }
 0x7a5   :  { %2380 = vmatmul.msk.f32.vlgmr.msra.gmra.mxu3 %vm288_vm3, %v2543_v3  ;;  %v2584_v3 = vld [vmem:[#allocation2 + $0x570] sm:$0xff] }
 0x7ad   :  { %2381 = vmatmul.msk.f32.gmra.mxu3 %vm288_vm3, %v2544_v18 }
 0x7b5   :  { %2382 = vmatmul.msk.f32.gmra.mxu3 %vm288_vm3, %v2545_v63 }
 0x7b7   :  { %v3651_v0 = vpop.permute.xlu0 %1651 }
 0x7b8   :  { %2366 = vmatmul.msk.f32.gmra.mxu2 %vm223_vm1, %v3651_v0 }
 0x7bd   :  { %v1557_v42 = vpop.f32.mrf.mxu0  ;;  %2383 = vmatmul.msk.f32.gmra.mxu3 %vm288_vm3, %v2546_v23 }
 0x7be   :  { %v1591_v16 = vmul.f32 %v2549_v60, %v1557_v42 }
 0x7c3   :  { %v1583_v49 = vpop.f32.mrf.mxu2 }
 0x7c4   :  { %v1592_v4 = vmul.f32 %v2553_v52, %v1583_v49 }
 0x7c5   :  { %v1560_v33 = vpop.f32.mrf.mxu0  ;;  %2384 = vmatmul.msk.f32.gmra.mxu3 %vm288_vm3, %v2547_v17 }
 0x7c6   :  { %v1593_v53 = vmul.f32 %v2548_v46, %v1560_v33 }
 0x7c8   :  { %2357 = vmatpush.msk.msrb.mxu1 %vm292_vm2, %v1593_v53 }
 0x7ca   :  { %1615 = vmatpush.msrb.mxu1 %v1591_v16 }
 0x7cb   :  { %v1586_v31 = vpop.f32.mrf.mxu2 }
 0x7cc   :  { %v1594_v24 = vmul.f32 %v2551_v1, %v1586_v31  ;;  %1616 = vmatpush.msrb.mxu1 %v1589_v22  ;;  %v2585_v1 = vld [vmem:[#allocation2 + $0x660] sm:$0xff] }
 0x7cd   :  { %2358 = vmatmul.msk.f32.vlgmr.msrb.gmra.mxu1 %vm288_vm3, %v3818_v35  ;;  %2385 = vmatmul.msk.f32.gmra.mxu3 %vm288_vm3, %v2552_v56  ;;  %v2586_v56 = vld [vmem:[#allocation2 + $0x670] sm:$0xff] }
 0x7ce   :  { %2360 = vmatpush.msk.msrb.mxu0 %vm292_vm2, %v1594_v24  ;;  %1672 = vmatpush.msra.mxu1 %v3600_v61  ;;  %v2560_v61 = vld [vmem:[#allocation2 + $0x3e0] sm:$0xff] }
 0x7d0   :  { %1756 = vmatpush.msrb.mxu1 %v2554_v25  ;;  %1638 = vmatpush.msrb.mxu0 %v1592_v4 }
 0x7d2   :  { %1757 = vmatpush.msrb.mxu1 %v2556_v27  ;;  %1639 = vmatpush.msrb.mxu0 %v1590_v5  ;;  %v2587_v27 = vld [vmem:[#allocation2 + $0x650] sm:$0xff] }
 0x7d3   :  { %2361 = vmatmul.msk.f32.vlgmr.msrb.gmra.mxu0 %vm288_vm3, %v3818_v35 }
 0x7d4   :  { %1758 = vmatpush.msrb.mxu1 %v2557_v29  ;;  %1721 = vmatpush.msra.mxu0 %v2558_v54 }
 0x7d5   :  { %2359 = vmatmul.msk.f32.gmra.mxu1 %vm288_vm3, %v3818_v35  ;;  %2386 = vmatmul.msk.f32.gmra.mxu3 %vm288_vm3, %v2559_v37 }
 0x7d6   :  { %1722 = vmatpush.msra.mxu0 %v2560_v61  ;;  %1759 = vmatpush.msrb.mxu1 %v2561_v45  ;;  %v2588_v61 = vld [vmem:[#allocation2 + $0x640] sm:$0xff] }
 0x7d8   :  { %1723 = vmatpush.msra.mxu0 %v2562_v26  ;;  %v2589_v26 = vld [vmem:[#allocation2 + $0x630] sm:$0xff] }
 0x7da   :  { %1724 = vmatpush.msra.mxu0 %v2563_v43 }
 0x7db   :  { %2362 = vmatmul.msk.f32.gmra.mxu0 %vm288_vm3, %v3818_v35  ;;  %v2572_v35 = vld [vmem:[#allocation2 + $0x370] sm:$0xff] }
 0x7dc   :  { %1725 = vmatpush.msra.mxu0 %v2564_v21 }
 0x7dd   :  { %2363 = vmatmul.msk.f32.vlgmr.msra.gmra.mxu1 %vm223_vm1, %v3635_v7  ;;  %2387 = vmatmul.msk.f32.gmra.mxu3 %vm288_vm3, %v2565_v10  ;;  %v2583_v7 = vld [vmem:[#allocation2 + $0x560] sm:$0xff] }
 0x7de   :  { %1726 = vmatpush.msra.mxu0 %v2566_v51  ;;  %1802 = vmatpush.msra.mxu1 %v2567_v34  ;;  %v2590_v51 = vld [vmem:[#allocation2 + $0x620] sm:$0xff] }
 0x7e0   :  { %1727 = vmatpush.msra.mxu0 %v2568_v19  ;;  %1803 = vmatpush.msra.mxu1 %v2569_v59 }
 0x7e2   :  { %1728 = vmatpush.msra.mxu0 %v2570_v20  ;;  %1804 = vmatpush.msra.mxu1 %v2571_v30  ;;  %v2591_v20 = vld [vmem:[#allocation2 + $0x610] sm:$0xff] }
 0x7e4   :  { %1729 = vmatpush.msra.mxu0 %v2572_v35  ;;  %1805 = vmatpush.msra.mxu1 %v2573_v39  ;;  %v2592_v39 = vld [vmem:[#allocation2 + $0x600] sm:$0xff] }
 0x7e5   :  { %2364 = vmatmul.msk.f32.gmra.mxu1 %vm223_vm1, %v3651_v0  ;;  %2388 = vmatmul.msk.f32.gmra.mxu3 %vm288_vm3, %v2574_v44 }
 0x7e6   :  { %1730 = vmatpush.msra.mxu0 %v2575_v50 }
 0x7e8   :  { %1731 = vmatpush.msra.mxu0 %v2576_v38 }
 0x7ea   :  { %1732 = vmatpush.msra.mxu0 %v2577_v12 }
 0x7ec   :  { %1733 = vmatpush.msra.mxu0 %v2578_v55  ;;  %v2593_v55 = vld [vmem:[#allocation2 + $0x440] sm:$0xff] }
 0x7ed   :  { %2389 = vmatmul.msk.f32.gmra.mxu3 %vm288_vm3, %v2579_v8 }
 0x7ee   :  { %1734 = vmatpush.msra.mxu0 %v2580_v13  ;;  %v2594_v13 = vld [vmem:[#allocation2 + $0x6a0] sm:$0xff] }
 0x7f0   :  { %1735 = vmatpush.msra.mxu0 %v2581_v47 }
 0x7f2   :  { %1736 = vmatpush.msra.mxu0 %v2582_v14  ;;  %v2595_v14 = vld [vmem:[#allocation2 + $0x6b0] sm:$0xff] }
 0x7f4   :  { %2371 = vmatpush.msk.msrb.mxu0 %vm292_vm2, %v3631_v58 }
 0x7f5   :  { %2390 = vmatmul.msk.f32.gmra.mxu3 %vm288_vm3, %v2583_v7 }
 0x7f6   :  { %1901 = vmatpush.msrb.mxu0 %v2434_v57 }
 0x7f8   :  { %1902 = vmatpush.msrb.mxu0 %v2435_v11 }
 0x7fd   :  { %2391 = vmatmul.msk.f32.gmra.mxu3 %vm288_vm3, %v2584_v3  ;;  %v2596_v3 = vld [vmem:[#allocation2 + $0x690] sm:$0xff] }
 0x81b   :  { %v1697_v58 = vpop.f32.mrf.mxu2 }
 0x828   :  { %v3685_v18 = vpop.f32.mrf.mxu3 }
 0x829   :  { %v1972_v44 = vmul.f32 %v2592_v39, %v3685_v18 }
 0x830   :  { %v1931_v6 = vpop.f32.mrf.mxu3 }
 0x831   :  { %v1973_v30 = vmul.f32 %v2591_v20, %v1931_v6  ;;  %v2597_v6 = vld [vmem:[#allocation2 + $0x680] sm:$0xff] }
 0x838   :  { %v1934_v63 = vpop.f32.mrf.mxu3 }
 0x839   :  { %v1974_v34 = vmul.f32 %v2590_v51, %v1934_v63 }
 0x83b   :  { %v1700_v17 = vpop.f32.mrf.mxu2 }
 0x840   :  { %v1937_v0 = vpop.f32.mrf.mxu3 }
 0x841   :  { %v1975_v43 = vmul.f32 %v2589_v26, %v1937_v0  ;;  %v2598_v0 = vld [vmem:[#allocation2 + $0x450] sm:$0xff] }
 0x848   :  { %v1940_v28 = vpop.f32.mrf.mxu3 }
 0x849   :  { %v1976_v45 = vmul.f32 %v2588_v61, %v1940_v28  ;;  %v2599_v28 = vld [vmem:[#allocation2 + $0x460] sm:$0xff] }
 0x84a   :  { %v1618_v42 = vpop.f32.mrf.mxu1 }
 0x850   :  { %v1641_v23 = vpop.f32.mrf.mxu0  ;;  %v1943_v49 = vpop.f32.mrf.mxu3 }
 0x851   :  { %v1698_v57 = vadd.f32 %v1697_v58, %v1641_v23  ;;  %v1977_v29 = vmul.f32 %v2587_v27, %v1943_v49  ;;  %v2601_v58 = vld [vmem:[#allocation2 + $0x480] sm:$0xff]  ;;  %v2602_v23 = vld [vmem:[#allocation2 + $0x490] sm:$0xff] }
 0x852   :  { %v1621_v33 = vpop.f32.mrf.mxu1  ;;  %v2603_v49 = vld [vmem:[#allocation2 + $0x4a0] sm:$0xff] }
 0x853   :  { %2499 = vtanh.f32 %v1698_v57  ;;  %v2604_v57 = vld [vmem:[#allocation2 + $0x4b0] sm:$0xff] }
 0x858   :  { %v1644_v46 = vpop.f32.mrf.mxu0  ;;  %v1946_v9 = vpop.f32.mrf.mxu3 }
 0x859   :  { %v2500_v11 = vpop.eup %2499  ;;  %v1701_v53 = vadd.f32 %v1700_v17, %v1644_v46  ;;  %v1978_v24 = vmul.f32 %v2585_v1, %v1946_v9 }
 0x85a   :  { %v1709_v60 = vmul.f32 1.442695, %v2500_v11  ;;  %v1674_v16 = vpop.f32.mrf.mxu1 }
 0x85b   :  { %2501 = vtanh.f32 %v1701_v53  ;;  %v1675_v48 = vadd.f32 %v1674_v16, %v1618_v42  ;;  %v2600_v42 = vld [vmem:[#allocation2 + $0x470] sm:$0xff] }
 0x85c   :  { %2503 = vpow2.f32 %v1709_v60 }
 0x85d   :  { %2505 = vtanh.f32 %v1675_v48 }
 0x860   :  { %v1949_v22 = vpop.f32.mrf.mxu3 }
 0x861   :  { %v2502_v31 = vpop.eup %2501  ;;  %v1979_v52 = vmul.f32 %v2586_v56, %v1949_v22 }
 0x862   :  { %v3687_v4 = vpop.eup %2503  ;;  %v1713_v25 = vmul.f32 1.442695, %v2502_v31  ;;  %v1677_v62 = vpop.f32.mrf.mxu1 }
 0x863   :  { %v2506_v5 = vpop.eup %2505  ;;  %v1678_v54 = vadd.f32 %v1677_v62, %v1621_v33  ;;  %2367 = vmatmul.msk.f32.vlgmr.msrb.gmra.mxu1 %vm144_vm0, %v3687_v4  ;;  %1990 = vmatpush.msrb.mxu3 %v1979_v52 }
 0x864   :  { %2507 = vpow2.f32 %v1713_v25  ;;  %v1707_v37 = vmul.f32 1.442695, %v2506_v5 }
 0x865   :  { %2509 = vtanh.f32 %v1678_v54  ;;  %1991 = vmatpush.msrb.mxu3 %v1978_v24 }
 0x866   :  { %2511 = vpow2.f32 %v1707_v37 }
 0x867   :  { %1992 = vmatpush.msrb.mxu3 %v1977_v29 }
 0x868   :  { %v1952_v21 = vpop.f32.mrf.mxu3 }
 0x869   :  { %1993 = vmatpush.msrb.mxu3 %v1976_v45  ;;  %v1980_v63 = vmul.f32 %v2597_v6, %v1952_v21 }
 0x86a   :  { %v3691_v10 = vpop.eup %2507 }
 0x86b   :  { %v2510_v19 = vpop.eup %2509  ;;  %2368 = vmatmul.msk.f32.gmra.mxu1 %vm144_vm0, %v3691_v10  ;;  %1994 = vmatpush.msrb.mxu3 %v1975_v43 }
 0x86c   :  { %v3695_v59 = vpop.eup %2511  ;;  %v1711_v35 = vmul.f32 1.442695, %v2510_v19 }
 0x86d   :  { %1737 = vmatmul.f32.vlgmr.msra.gmra.mxu0 %v3695_v59  ;;  %1783 = vmatmul.f32.vlgmr.msra.gmra.mxu2 %v3695_v59  ;;  %v1813_v45 = vmul.f32 %v3695_v59, %v3515_v32  ;;  %v1814_v32 = vmul.f32 %v3687_v4, %v3573_v36 }
 0x86e   :  { %2513 = vpow2.f32 %v1711_v35  ;;  %1995 = vmatpush.msrb.mxu3 %v1974_v34 }
 0x870   :  { %v1955_v50 = vpop.f32.mrf.mxu3  ;;  %1996 = vmatpush.msrb.mxu3 %v1973_v30 }
 0x871   :  { %v1981_v18 = vmul.f32 %v2596_v3, %v1955_v50 }
 0x872   :  { %1997 = vmatpush.msrb.mxu3 %v1972_v44 }
 0x873   :  { %2369 = vmatmul.msk.f32.vlgmr.msra.gmra.mxu1 %vm144_vm0, %v3687_v4 }
 0x874   :  { %v3702_v38 = vpop.eup %2513 }
 0x875   :  { %1740 = vmatmul.f32.gmra.mxu0 %v3702_v38  ;;  %1786 = vmatmul.f32.gmra.mxu2 %v3702_v38 }
 0x878   :  { %v1958_v12 = vpop.f32.mrf.mxu3 }
 0x879   :  { %v1982_v47 = vmul.f32 %v2594_v13, %v1958_v12 }
 0x87b   :  { %2370 = vmatmul.msk.f32.gmra.mxu1 %vm144_vm0, %v3691_v10 }
 0x87d   :  { %2372 = vmatmul.msk.f32.vlgmr.msrb.gmra.mxu0 %vm288_vm3, %v2593_v55 }
 0x880   :  { %v1961_v8 = vpop.f32.mrf.mxu3 }
 0x881   :  { %v1983_v7 = vmul.f32 %v2595_v14, %v1961_v8 }
 0x883   :  { %2025 = vmatpush.msrb.mxu1 %v1983_v7 }
 0x885   :  { %2373 = vmatmul.msk.f32.gmra.mxu0 %vm288_vm3, %v2598_v0  ;;  %2026 = vmatpush.msrb.mxu1 %v1982_v47 }
 0x887   :  { %2027 = vmatpush.msrb.mxu1 %v1981_v18 }
 0x889   :  { %2028 = vmatpush.msrb.mxu1 %v1980_v63  ;;  %v1815_v63 = vmul.f32 %v3702_v38, %v3571_v40 }
 0x88b   :  { %2398 = vmatpush.msk.msra.mxu1 %vm292_vm2, %v3624_v2 }
 0x88d   :  { %2105 = vmatpush.msra.mxu1 %v3618_v41  ;;  %2374 = vmatmul.msk.f32.gmra.mxu0 %vm288_vm3, %v2599_v28 }
 0x895   :  { %2375 = vmatmul.msk.f32.gmra.mxu0 %vm288_vm3, %v2600_v42 }
 0x89d   :  { %2376 = vmatmul.msk.f32.gmra.mxu0 %vm288_vm3, %v2601_v58 }
 0x8a5   :  { %2377 = vmatmul.msk.f32.gmra.mxu0 %vm288_vm3, %v2602_v23 }
 0x8ad   :  { %2378 = vmatmul.msk.f32.gmra.mxu0 %vm288_vm3, %v2603_v49 }
 0x8b5   :  { %2379 = vmatmul.msk.f32.gmra.mxu0 %vm288_vm3, %v2604_v57  ;;  %v1816_v57 = vmul.f32 %v3691_v10, %v3575_v15  ;;  %v2608_v15 = vld [vmem:[#allocation2 + $0x5c0] sm:$0xff] }
 0x8e0   :  { %v1761_v2 = vpop.f32.mrf.mxu1 }
 0x8e8   :  { %v1764_v41 = vpop.f32.mrf.mxu1 }
 0x8ea   :  { %v1738_v33 = vpop.f32.mrf.mxu0 }
 0x8eb   :  { %v1762_v17 = vadd.f32 %v1761_v2, %v1738_v33 }
 0x8ed   :  { %2515 = vrcp.f32 %v1762_v17  ;;  %v1828_v31 = vand.u32 2147483648, %v1762_v17  ;;  %v1826_v24 = vand.u32 2147483647, %v1762_v17  ;;  %vm1822_vm8 = vweird.f32 %v1762_v17 }
 0x8ef   :  { %v1829_v54 = vor.u32 1.1754944e-38, %v1828_v31  ;;  %vm1827_vm10 = vcmp.eq.f32.partialorder %v1826_v24, 8.507059e+37  ;;  %v2609_v31 = vld [vmem:[#allocation2 + $0x5b0] sm:$0xff]  ;;  %v2610_v24 = vld [vmem:[#allocation2 + $0x5a0] sm:$0xff] }
 0x8f0   :  { %v1784_v46 = vpop.f32.mrf.mxu2  ;;  %v1807_v9 = vpop.f32.mrf.mxu1 }
 0x8f1   :  { %v1808_v11 = vadd.f32 %v1807_v9, %v1784_v46 }
 0x8f2   :  { %v1741_v53 = vpop.f32.mrf.mxu0 }
 0x8f3   :  { %v2516_v60 = vpop.eup %2515  ;;  %2517 = vrcp.f32 %v1808_v11  ;;  %v1765_v48 = vadd.f32 %v1764_v41, %v1741_v53  ;;  %v1843_v43 = vand.u32 2147483648, %v1808_v11  ;;  %v1841_v19 = vand.u32 2147483647, %v1808_v11 }
 0x8f4   :  { %v1818_v16 = vmul.f32 %v2516_v60, %v1762_v17  ;;  %vm1823_vm1 = vweird.f32 %v2516_v60  ;;  %vm1837_vm12 = vweird.f32 %v1808_v11 }
 0x8f5   :  { %2519 = vrcp.f32 %v1765_v48  ;;  %vm1824_vm9 = vmor %vm1822_vm8, %vm1823_vm1  ;;  %v1858_v39 = vand.u32 2147483648, %v1765_v48  ;;  %v1844_v50 = vor.u32 1.1754944e-38, %v1843_v43  ;;  %v1856_v55 = vand.u32 2147483647, %v1765_v48 }
 0x8f6   :  { %v1819_v22 = vsub.f32 1.0, %v1818_v16  ;;  %vm1842_vm15 = vcmp.eq.f32.partialorder %v1841_v19, 8.507059e+37  ;;  %vm1852_vm4 = vweird.f32 %v1765_v48  ;;  %v2129_v19 = vld [vmem:[#allocation2 + $0x210] sm:$0xff] }
 0x8f7   :  { %v1859_v18 = vor.u32 1.1754944e-38, %v1858_v39  ;;  %vm1857_vm6 = vcmp.eq.f32.partialorder %v1856_v55, 8.507059e+37  ;;  %v2190_v55 = vld [vmem:[#allocation2 + $0x270] sm:$0xff] }
 0x8f8   :  { %v1820_v1 = vmul.f32 %v2516_v60, %v1819_v22  ;;  %v1787_v56 = vpop.f32.mrf.mxu2  ;;  %v1810_v52 = vpop.f32.mrf.mxu1 }
 0x8f9   :  { %v2518_v25 = vpop.eup %2517  ;;  %v1811_v62 = vadd.f32 %v1810_v52, %v1787_v56  ;;  %v2611_v52 = vld [vmem:[#allocation2 + $0x590] sm:$0xff] }
 0x8fa   :  { %v1821_v5 = vadd.f32 %v2516_v60, %v1820_v1  ;;  %v1833_v27 = vmul.f32 %v2518_v25, %v1808_v11  ;;  %v3719_v29 = vpop.f32.mrf.mxu0  ;;  %vm1838_vm11 = vweird.f32 %v2518_v25  ;;  %v2605_v11 = vld [vmem:[#allocation2 + $0x5f0] sm:$0xff] }
 0x8fb   :  { %2521 = vrcp.f32 %v1811_v62  ;;  %v2520_v37 = vpop.eup %2519  ;;  %vm1839_vm13 = vmor %vm1837_vm12, %vm1838_vm11  ;;  %v1873_v6 = vand.u32 2147483648, %v1811_v62  ;;  %v1871_v36 = vand.u32 2147483647, %v1811_v62  ;;  %vm1867_vm1 = vweird.f32 %v1811_v62 }
 0x8fc   :  { %v1834_v61 = vsub.f32 1.0, %v1833_v27  ;;  %v1825_v26 = vsel %vm1824_vm9, %v2516_v60, %v1821_v5  ;;  %v1848_v21 = vmul.f32 %v2520_v37, %v1765_v48  ;;  %vm1853_vm14 = vweird.f32 %v2520_v37  ;;  %v2606_v60 = vld [vmem:[#allocation2 + $0x5e0] sm:$0xff]  ;;  %v2607_v48 = vld [vmem:[#allocation2 + $0x5d0] sm:$0xff] }
 0x8fd   :  { %v1830_v51 = vsel %vm1827_vm10, %v1829_v54, %v1825_v26  ;;  %vm1854_vm5 = vmor %vm1852_vm4, %vm1853_vm14  ;;  %v1874_v23 = vor.u32 1.1754944e-38, %v1873_v6  ;;  %vm1872_vm9 = vcmp.eq.f32.partialorder %v1871_v36, 8.507059e+37  ;;  %v132_v27 = vld [vmem:[#allocation2 + $0x710] sm:$0x3]  ;;  %v133_v54 = vld [vmem:[#allocation2 + $0x720] sm:$0x3] }
 0x8fe   :  { %v1835_v34 = vmul.f32 %v2518_v25, %v1834_v61  ;;  %v3723_v20 = vmul.f32 %v1830_v51, %v1813_v45  ;;  %v1849_v30 = vsub.f32 1.0, %v1848_v21  ;;  %2395 = vmatmul.msk.f32.vlgmr.msrb.gmra.mxu2 %vm288_vm3, %v132_v27  ;;  %vm2061_vm10 = vcmask 97280   ;;  %v2132_v51 = vld [vmem:[#allocation2 + $0x240] sm:$0xff] }
 0x900   :  { %v1836_v35 = vadd.f32 %v2518_v25, %v1835_v34  ;;  %v1850_v12 = vmul.f32 %v2520_v37, %v1849_v30  ;;  %v2131_v34 = vld [vmem:[#allocation2 + $0x230] sm:$0xff] }
 0x901   :  { %v2522_v44 = vpop.eup %2521  ;;  %v2127_v30 = vld [vmem:[#allocation2 + $0x1f0] sm:$0xff] }
 0x902   :  { %v1840_v59 = vsel %vm1839_vm13, %v2518_v25, %v1836_v35  ;;  %v1863_v8 = vmul.f32 %v2522_v44, %v1811_v62  ;;  %v1907_v13 = vpop.f32.mrf.mxu0  ;;  %v1851_v14 = vadd.f32 %v2520_v37, %v1850_v12  ;;  %vm1868_vm7 = vweird.f32 %v2522_v44  ;;  %v2612_v62 = vld [vmem:[#allocation2 + $0x580] sm:$0xff] }
 0x903   :  { %v1845_v47 = vsel %vm1842_vm15, %v1844_v50, %v1840_v59  ;;  %vm1869_vm8 = vmor %vm1867_vm1, %vm1868_vm7  ;;  %v1965_v25 = vmul.f32 %v2611_v52, %v1907_v13  ;;  %v1964_v5 = vmul.f32 %v2612_v62, %v3719_v29  ;;  %v2133_v29 = vld [vmem:[#allocation2 + $0x250] sm:$0xff]  ;;  %v2126_v35 = vld [vmem:[#allocation2 + $0x1e0] sm:$0xff]  ;;  %v2675_v13 = vmov 0  }
 0x904   :  { %v1846_v7 = vmul.f32 %v1845_v47, %v1814_v32  ;;  %v1864_v3 = vsub.f32 1.0, %v1863_v8  ;;  %v1855_v0 = vsel %vm1854_vm5, %v2520_v37, %v1851_v14  ;;  %v2192_v50 = vld [vmem:[#allocation2 + $0x290] sm:$0xff]  ;;  %v2191_v12 = vld [vmem:[#allocation2 + $0x280] sm:$0xff]  ;;  %v2674_v8 = vmov 1   ;;  %2436 = vset.pattern.permute.xlu0 %v2675_v13 }
 0x905   :  { %v1860_v4 = vsel %vm1857_vm6, %v1859_v18, %v1855_v0  ;;  %v2189_v32 = vld [vmem:[#allocation2 + $0x260] sm:$0xff]  ;;  %2437 = vset.pattern.permute.xlu1 %v2674_v8 }
 0x906   :  { %v1865_v28 = vmul.f32 %v2522_v44, %v1864_v3  ;;  %2392 = vmatmul.msk.f32.vlgmr.msrb.gmra.mxu1 %vm144_vm0, %v1846_v7  ;;  %v1861_v42 = vmul.f32 %v1860_v4, %v1815_v63  ;;  %v2110_v59 = vld [vmem:[%s3748_s2] sm:$0x3]  ;;  %s2676_s2 = smov [#allocation5]  }
 0x907   :  { %2172 = vmatpush.msrb.mxu1 %v2129_v19  ;;  %2523 = vrcp.f32 %v2110_v59  ;;  %v2122_v7 = vand.u32 2147483648, %v2110_v59  ;;  %v2120_v18 = vand.u32 2147483647, %v2110_v59  ;;  %s2231_s10 = sshll.u32 %s2676_s2, 4  ;;  %s2232_s10 = int_to_ptr.vmem [resolvable:$true] %s2231_s10 }
 0x908   :  { %v1866_v58 = vadd.f32 %v2522_v44, %v1865_v28 }
 0x909   :  { %v2123_v63 = vor.u32 1.1754944e-38, %v2122_v7  ;;  %vm2121_vm12 = vcmp.eq.f32.partialorder %v2120_v18, 8.507059e+37 }
 0x90a   :  { %v1910_v49 = vpop.f32.mrf.mxu0  ;;  %v1870_v2 = vsel %vm1869_vm8, %v2522_v44, %v1866_v58  ;;  %v2130_v44 = vld [vmem:[#allocation2 + $0x220] sm:$0xff]  ;;  %v2180_v58 = vld [vmem:[#allocation2 + $0x2b0] ss:$0 sm:$0xff] }
 0x90b   :  { %v1875_v40 = vsel %vm1872_vm9, %v1874_v23, %v1870_v2  ;;  %v1966_v56 = vmul.f32 %v2610_v24, %v1910_v49  ;;  %v2181_v2 = vmul.f32 6.0, %v2180_v58 }
 0x90c   :  { %v1876_v38 = vmul.f32 %v1875_v40, %v1816_v57 }
 0x90d   :  { %v2524_v47 = vpop.eup %2523 }
 0x90e   :  { %2393 = vmatmul.msk.f32.gmra.mxu1 %vm144_vm0, %v1876_v38  ;;  %v2112_v14 = vmul.f32 %v2524_v47, %v2110_v59  ;;  %vm2117_vm3 = vweird.f32 %v2524_v47 }
 0x910   :  { %v2113_v3 = vsub.f32 1.0, %v2112_v14 }
 0x912   :  { %v1913_v41 = vpop.f32.mrf.mxu0  ;;  %v2114_v6 = vmul.f32 %v2524_v47, %v2113_v3 }
 0x913   :  { %v1967_v1 = vmul.f32 %v2609_v31, %v1913_v41 }
 0x914   :  { %v2115_v0 = vadd.f32 %v2524_v47, %v2114_v6 }
 0x916   :  { %2399 = vmatmul.msk.f32.vlgmr.msra.gmra.mxu1 %vm2061_vm10, %v133_v54 }
 0x91a   :  { %v1916_v33 = vpop.f32.mrf.mxu0 }
 0x91b   :  { %v1968_v10 = vmul.f32 %v2608_v15, %v1916_v33 }
 0x922   :  { %v1919_v17 = vpop.f32.mrf.mxu0 }
 0x923   :  { %v1969_v22 = vmul.f32 %v2607_v48, %v1919_v17 }
 0x92a   :  { %v1922_v46 = vpop.f32.mrf.mxu0 }
 0x92b   :  { %v1970_v16 = vmul.f32 %v2606_v60, %v1922_v46 }
 0x932   :  { %v1925_v9 = vpop.f32.mrf.mxu0 }
 0x933   :  { %v1971_v53 = vmul.f32 %v2605_v11, %v1925_v9  ;;  %v2222_v9 = vld [vmem:[#allocation2 + $0x2a0] ss:$0 sm:$0xff] }
 0x935   :  { %1998 = vmatpush.msrb.mxu3 %v1971_v53 }
 0x937   :  { %1999 = vmatpush.msrb.mxu3 %v1970_v16 }
 0x939   :  { %2000 = vmatpush.msrb.mxu3 %v1969_v22 }
 0x93b   :  { %2001 = vmatpush.msrb.mxu3 %v1968_v10 }
 0x93d   :  { %2002 = vmatpush.msrb.mxu3 %v1967_v1 }
 0x93f   :  { %2003 = vmatpush.msrb.mxu3 %v1966_v56 }
 0x941   :  { %2004 = vmatpush.msrb.mxu3 %v1965_v25 }
 0x943   :  { %2005 = vmatpush.msrb.mxu3 %v1964_v5 }
 0x944   :  { %2006 = vmatmul.f32.vlgmr.msrb.gmra.mxu3 %v3723_v20  ;;  %v2128_v20 = vld [vmem:[#allocation2 + $0x200] sm:$0xff] }
 0x945   :  { %2173 = vmatpush.msrb.mxu1 %v2128_v20 }
 0x947   :  { %2174 = vmatpush.msrb.mxu1 %v2127_v30 }
 0x949   :  { %2175 = vmatpush.msrb.mxu1 %v2126_v35 }
 0x94c   :  { %2009 = vmatmul.f32.gmra.mxu3 %v1861_v42 }
 0x981   :  { %v2058_v39 = vpop.f32.mrf.mxu2 }
 0x982   :  { %2401 = vmatmul.msk.f32.vlgmr.msrb.gmra.mxu1 %vm144_vm0, %v2058_v39 }
 0x983   :  { %v2030_v37 = vpop.f32.mrf.mxu1 }
 0x98b   :  { %v2033_v45 = vpop.f32.mrf.mxu1 }
 0x993   :  { %v2107_v42 = vpop.f32.mrf.mxu1 }
 0x9c7   :  { %v2007_v61 = vpop.f32.mrf.mxu3 }
 0x9c8   :  { %v2031_v21 = vadd.f32 %v2030_v37, %v2007_v61 }
 0x9cf   :  { %v2010_v26 = vpop.f32.mrf.mxu3 }
 0x9d0   :  { %v2034_v43 = vadd.f32 %v2033_v45, %v2010_v26 }
 0x9d2   :  { %2396 = vmatpush.msk.msra.mxu2 %vm292_vm2, %v2034_v43  ;;  %vm2116_vm2 = vweird.f32 %v2110_v59 }
 0x9d3   :  { %vm2118_vm11 = vmor %vm2116_vm2, %vm2117_vm3 }
 0x9d4   :  { %2083 = vmatpush.msra.mxu2 %v2031_v21  ;;  %v2119_v28 = vsel %vm2118_vm11, %v2524_v47, %v2115_v0 }
 0x9d5   :  { %2397 = vmatmul.msk.f32.vlgmr.msra.gmra.mxu2 %vm2061_vm10, %v133_v54  ;;  %v2124_v36 = vsel %vm2121_vm12, %v2123_v63, %v2119_v28 }
 0x9d6   :  { %2149 = vmatpush.msrb.mxu2 %v2133_v29  ;;  %2185 = vperm.xlu0 %2436, %v2124_v36  }
 0x9d7   :  { %2217 = vperm.xlu1 %2437, %v2124_v36  }
 0x9d8   :  { %2150 = vmatpush.msrb.mxu2 %v2132_v51 }
 0x9da   :  { %2151 = vmatpush.msrb.mxu2 %v2131_v34 }
 0x9dc   :  { %2152 = vmatpush.msrb.mxu2 %v2130_v44 }
 0x9de   :  { %2208 = vmatpush.msra.mxu2 %v2192_v50  ;;  %2438 = vset.pattern.permute.xlu0 %v2674_v8 }
 0x9e0   :  { %2209 = vmatpush.msra.mxu2 %v2191_v12 }
 0x9e2   :  { %2210 = vmatpush.msra.mxu2 %v2190_v55 }
 0x9e4   :  { %2211 = vmatpush.msra.mxu2 %v2189_v32 }
 0x9ff   :  { %v2177_v49 = vpop.f32.mrf.mxu1 }
 0xa48   :  { %v2186_v38 = vpop.permute.xlu0 %2185 }
 0xa49   :  { %v2218_v41 = vpop.permute.xlu1 %2217 }
 0xa58   :  { %v2085_v4 = vpop.f32.mrf.mxu2 }
 0xa59   :  { %2400 = vmatmul.msk.f32.vlgmr.msrb.gmra.mxu2 %vm144_vm0, %v2085_v4 }
 0xa61   :  { %2402 = vmatmul.msk.f32.vlgmr.msra.gmra.mxu2 %vm144_vm0, %v2107_v42  ;;  %vm2224_vm0 = vcmask 17408  }
 0xadc   :  { %v2154_v23 = vpop.f32.mrf.mxu2 }
 0xadd   :  { %v2178_v57 = vadd.f32 %v2177_v49, %v2154_v23 }
 0xadf   :  { %v2182_v40 = vadd.f32 %v2181_v2, %v2178_v57 }
 0xae1   :  { %v2188_v17 = vmul.f32 %v2186_v38, %v2182_v40 }
 0xae4   :  { %v2213_v33 = vpop.f32.mrf.mxu2 }
 0xae5   :  { %v2220_v46 = vmul.f32 %v2218_v41, %v2213_v33 }
 0xae7   :  { %v2221_v11 = vadd.f32 %v2220_v46, %v2188_v17 }
 0xae9   :  { %v2223_v53 = vadd.f32 %v2222_v9, %v2221_v11 }
 0xaeb   :  { %2225 = vst.msk [vmem:[#allocation5] sm:$0x3] %vm2224_vm0, %v2223_v53 }
 0xaec   :  { %2236 = dma.vmem_to_hbm [thread:$0]  %s2232_s10, 32, %s2234_s13, [#allocation4]  }
 0xaed   :  { %2663 = dma.done.wait [#allocation4], 32  }
 0xaee   :  { %2664 = vsyncadd [#allocation4], 4294967264 }
 0xaef   :  { %2241 = vsyncpa [#allocation3], 1 }
 0xaf0   :  { %2242 = vsyncpa [#allocation4], 1 }

</bundles_post_ra>
